<compile_context>
chip_gen: v7x
topology: tpu7x:2x2x1
jax: 0.10.0
libtpu: 0.0.40
codegen_flags: <defaults>
</compile_context>

<pallas_src>
import numpy as np
import jax
import jax.numpy as jnp
from jax.experimental import pallas as pl
from jax.experimental.pallas import tpu as pltpu

TIME_TILE = 8  # timesteps per grid step (also the fori_loop unroll factor)


def _round_up(x, m):
    return (x + m - 1) // m * m


def _pick_tile(n, cap, step):
    """Largest multiple of `step` that divides n, capped at `cap` (n % step == 0)."""
    t = min(n, cap)
    t -= t % step
    while t > step and n % t:
        t -= step
    return max(t, step)


# ---------------- kernel 1: time-tiled GRU recurrence ------------------------
def gru_recurrent_kernel(lens_ref, gi_ref, wh_ref, bh_ref, h0_ref,
                         y_ref, hf_ref, h_s):
    tile = pl.program_id(0)
    TT, Bp, _ = gi_ref.shape
    Hp = h0_ref.shape[1]

    @pl.when(tile == 0)
    def _():
        h_s[...] = h0_ref[...]

    lens = lens_ref[...]                                   # (Bp, 1) int32
    bh = bh_ref[...]                                       # (1, 3Hp)

    def step(k, h):
        t = tile * TT + k                                  # global timestep
        gi = gi_ref[k]                                     # (Bp, 3Hp) precomputed
        # NOTE: read wh_ref inside the step (don't pin 48 vregs across unroll)
        gh = jnp.dot(h, wh_ref[...], preferred_element_type=jnp.float32) + bh
        i_r, i_z, i_n = gi[:, :Hp], gi[:, Hp:2 * Hp], gi[:, 2 * Hp:]
        h_r, h_z, h_n = gh[:, :Hp], gh[:, Hp:2 * Hp], gh[:, 2 * Hp:]
        r = jax.nn.sigmoid(i_r + h_r)
        z = jax.nn.sigmoid(i_z + h_z)
        n = jnp.tanh(i_n + r * h_n)
        h_new = (1.0 - z) * n + z * h
        h_next = jnp.where(t < lens, h_new, h)             # freeze finished seqs
        y_ref[k] = h_next                                  # streamed out per tile
        return h_next

    h = jax.lax.fori_loop(0, TT, step, h_s[...], unroll=True)
    h_s[...] = h                                           # carry across tiles

    @pl.when(tile == pl.num_programs(0) - 1)
    def _():
        hf_ref[...] = h                                    # final hidden, once


def run_gru_recurrence(lens, gi, wh, bh, h0, *, time_tile):
    Tp, Bp, G = gi.shape
    Hp = h0.shape[1]
    return pl.pallas_call(
        gru_recurrent_kernel,
        grid=(Tp // time_tile,),
        in_specs=[
            pl.BlockSpec((Bp, 1), lambda i: (0, 0)),              # lengths
            pl.BlockSpec((time_tile, Bp, G), lambda i: (i, 0, 0)),  # gi stream
            pl.BlockSpec((Hp, G), lambda i: (0, 0)),              # W_hh (Hp,3Hp)
            pl.BlockSpec((1, G), lambda i: (0, 0)),               # b_hh
            pl.BlockSpec((Bp, Hp), lambda i: (0, 0)),             # h0
        ],
        out_specs=[
            pl.BlockSpec((time_tile, Bp, Hp), lambda i: (i, 0, 0)),  # y stream
            pl.BlockSpec((Bp, Hp), lambda i: (0, 0)),                # final h
        ],
        out_shape=[
            jax.ShapeDtypeStruct((Tp, Bp, Hp), jnp.float32),
            jax.ShapeDtypeStruct((Bp, Hp), jnp.float32),
        ],
        scratch_shapes=[pltpu.VMEM((Bp, Hp), jnp.float32)],        # h carry
        compiler_params=pltpu.CompilerParams(
            dimension_semantics=("arbitrary",)),
    )(lens, gi, wh, bh, h0)


# ---------------- kernel 2: output projection, tiled over (rows, V) ----------
def proj_kernel(y_ref, w_ref, b_ref, out_ref):
    out_ref[...] = (jnp.dot(y_ref[...], w_ref[...],
                            preferred_element_type=jnp.float32) + b_ref[...])


def run_projection(y_flat, wout, bout):
    N, Hp = y_flat.shape
    Vp = wout.shape[1]
    TR = _pick_tile(N, 512, 8)
    TV = _pick_tile(Vp, 512, 128)
    return pl.pallas_call(
        proj_kernel,
        grid=(N // TR, Vp // TV),
        in_specs=[
            pl.BlockSpec((TR, Hp), lambda i, j: (i, 0)),
            pl.BlockSpec((Hp, TV), lambda i, j: (0, j)),
            pl.BlockSpec((1, TV), lambda i, j: (0, j)),
        ],
        out_specs=pl.BlockSpec((TR, TV), lambda i, j: (i, j)),
        out_shape=jax.ShapeDtypeStruct((N, Vp), jnp.float32),
        compiler_params=pltpu.CompilerParams(
            dimension_semantics=("parallel", "parallel")),   # megacore on v7x
    )(y_flat, wout, bout)


# ------------------------------ param packing --------------------------------
def pack_params(embs, W_ih, b_ih, W_hh, b_hh, W_out, b_out, *, Hp, Vp):
    V, H = np.asarray(embs).shape

    # input gates depend only on the token id -> precompute the whole table once
    x = np.maximum(np.asarray(embs, np.float32), 0.0)                 # ReLU(emb)
    gi = x @ np.asarray(W_ih, np.float32).T + np.asarray(b_ih, np.float32)
    gi_table = np.zeros((V, 3 * Hp), np.float32)
    for g in range(3):
        gi_table[:, g * Hp:g * Hp + H] = gi[:, g * H:(g + 1) * H]

    def gate_weight(W):        # W: (3H, H), gates [r, z, n] stacked on rows
        out = np.zeros((Hp, 3 * Hp), np.float32)
        Wn = np.asarray(W, np.float32)
        for g in range(3):
            out[:H, g * Hp:g * Hp + H] = Wn[g * H:(g + 1) * H].T
        return jnp.asarray(out)

    def gate_bias(b):
        out = np.zeros((1, 3 * Hp), np.float32)
        bn = np.asarray(b, np.float32)
        for g in range(3):
            out[0, g * Hp:g * Hp + H] = bn[g * H:(g + 1) * H]
        return jnp.asarray(out)

    wout = np.zeros((Hp, Vp), np.float32)
    wout[:H, :V] = np.asarray(W_out, np.float32).T
    bout = np.zeros((1, Vp), np.float32)
    bout[0, :V] = np.asarray(b_out, np.float32)

    return {
        "gi_table": jnp.asarray(gi_table),
        "wh_p": gate_weight(W_hh), "bh_p": gate_bias(b_hh),
        "wout_p": jnp.asarray(wout), "bout_p": jnp.asarray(bout),
        "Hp": Hp, "Vp": Vp, "V": V, "H": H,
    }


# --------------------------------- wrapper ------------------------------------
def decoder_forward(inputt, hidden, lengths, params):
    """inputt: (B, T) int32 ids; hidden: (1, B, H); lengths: python ints, sorted desc."""
    B, T = inputt.shape
    H, V = params["H"], params["V"]
    Hp, Vp = params["Hp"], params["Vp"]
    Bp = max(8, _round_up(B, 8))
    Tp = _round_up(T, TIME_TILE)

    # gather precomputed input gates (XLA gather glue), time-major, padded
    ids = jnp.pad(jnp.transpose(inputt, (1, 0)).astype(jnp.int32),
                  ((0, Tp - T), (0, Bp - B)))
    gi = jnp.take(params["gi_table"], ids.reshape(-1), axis=0)
    gi = gi.reshape(Tp, Bp, 3 * Hp)

    h0 = jnp.pad(hidden[0].astype(jnp.float32), ((0, Bp - B), (0, Hp - H)))

    lens_np = np.zeros((Bp, 1), np.int32)
    lens_np[:B, 0] = np.asarray(lengths, np.int32)
    lens = jnp.asarray(lens_np)

    y, hf = run_gru_recurrence(lens, gi, params["wh_p"], params["bh_p"], h0,
                               time_tile=TIME_TILE)
    logits_all = run_projection(y.reshape(Tp * Bp, Hp),
                                params["wout_p"], params["bout_p"])

    # pack_padded_sequence (batch_first) row order, applied to the small logits
    ln = np.asarray(lengths)
    rows = np.asarray([t * Bp + b for t in range(T) for b in range(B) if ln[b] > t],
                      np.int32)
    logits = jnp.take(logits_all, jnp.asarray(rows), axis=0)[:, :V]
    h_final = hf[:B, :H][None]
    return logits, h_final                                  # ((N_packed, V), (1, B, H))


# -------------------------------- reference -----------------------------------
def reference(inputt, hidden, lengths, emb, W_ih, b_ih, W_hh, b_hh, W_out, b_out):
    x = np.maximum(np.asarray(jnp.take(emb, inputt, axis=0)), 0.0)   # (B, T, H)
    B, T, H = x.shape
    h = np.array(hidden[0], dtype=np.float64)
    ys = np.zeros((T, B, H), np.float64)
    lens = np.asarray(lengths)
    for t in range(T):
        xt = x[:, t].astype(np.float64)
        gi = xt @ W_ih.T + b_ih
        gh = h @ W_hh.T + b_hh
        i_r, i_z, i_n = gi[:, :H], gi[:, H:2 * H], gi[:, 2 * H:]
        h_r, h_z, h_n = gh[:, :H], gh[:, H:2 * H], gh[:, 2 * H:]
        r = 1.0 / (1.0 + np.exp(-(i_r + h_r)))
        z = 1.0 / (1.0 + np.exp(-(i_z + h_z)))
        n = np.tanh(i_n + r * h_n)
        h_new = (1.0 - z) * n + z * h
        m = (lens > t).astype(np.float64)[:, None]
        h = m * h_new + (1.0 - m) * h
        ys[t] = h
    packed = np.stack([ys[t, b] for t in range(T) for b in range(B) if lens[b] > t])
    logits = packed @ W_out.T + b_out
    return logits.astype(np.float32), h[None].astype(np.float32)


# ----------------------------------- main --------------------------------------
if __name__ == "__main__":
    B, T, H, V = 2, 8, 32, 64
    Hp, Vp = 128, 128                        # (8,128)-aligned padded sizes
    lengths = [8, 5]                         # sorted descending (pack requirement)

    key = jax.random.PRNGKey(0)
    ks = jax.random.split(key, 8)
    scale = 1.0 / np.sqrt(H)

    embs = jax.random.normal(ks[0], (V, H), jnp.float32) * 0.1
    W_ih = jax.random.uniform(ks[1], (3 * H, H), jnp.float32, -scale, scale)
    W_hh = jax.random.uniform(ks[2], (3 * H, H), jnp.float32, -scale, scale)
    b_ih = jax.random.uniform(ks[3], (3 * H,), jnp.float32, -scale, scale)
    b_hh = jax.random.uniform(ks[4], (3 * H,), jnp.float32, -scale, scale)
    W_out = jax.random.uniform(ks[5], (V, H), jnp.float32, -scale, scale)
    b_out = jax.random.uniform(ks[6], (V,), jnp.float32, -scale, scale)

    params = pack_params(np.array(embs), np.array(W_ih), np.array(b_ih),
                         np.array(W_hh), np.array(b_hh),
                         np.array(W_out), np.array(b_out),
                         Hp=Hp, Vp=Vp)

    inputt = jax.random.randint(ks[7], (B, T), 0, V, jnp.int32)
    hidden0 = jax.random.normal(jax.random.PRNGKey(1), (1, B, H), jnp.float32) * 0.1

    logits, h_final = decoder_forward(inputt, hidden0, lengths, params)
    logits = jax.block_until_ready(logits)
    h_final = jax.block_until_ready(h_final)

    # sanity check against a pure numpy GRU reference
    ref_logits, ref_h = reference(inputt, hidden0, lengths,
                                  embs, np.array(W_ih), np.array(b_ih),
                                  np.array(W_hh), np.array(b_hh),
                                  np.array(W_out), np.array(b_out))
    np.testing.assert_allclose(np.array(logits), ref_logits, rtol=5e-4, atol=5e-4)
    np.testing.assert_allclose(np.array(h_final), ref_h, rtol=5e-4, atol=5e-4)

    assert logits.shape == (sum(lengths), V)
    assert h_final.shape == (1, B, H)
    print("KERNEL_OK")
</pallas_src>

<mosaic_0001>
module attributes {stable_mosaic.version = 11 : i64} {
  func.func @gru_recurrent_kernel(%arg0: i32, %arg1: memref<8x1xi32, #tpu.memory_space<vmem>>, %arg2: memref<8x8x384xf32, #tpu.memory_space<vmem>>, %arg3: memref<128x384xf32, #tpu.memory_space<vmem>>, %arg4: memref<1x384xf32, #tpu.memory_space<vmem>>, %arg5: memref<8x128xf32, #tpu.memory_space<vmem>>, %arg6: memref<8x8x128xf32, #tpu.memory_space<vmem>>, %arg7: memref<8x128xf32, #tpu.memory_space<vmem>>, %arg8: memref<8x128xf32, #tpu.memory_space<vmem>>) attributes {dimension_semantics = [#tpu.dimension_semantics<arbitrary>], iteration_bounds = array<i64: 1>, scalar_prefetch = 0 : i64, scratch_operands = 1 : i64, tpu.core_type = #tpu.core_type<tc>, window_params = [{pipeline_mode = #tpu.pipeline_mode<synchronous>, transform_indices = @transform_0, window_bounds = array<i64: 8, 1>}, {transform_indices = @transform_1, window_bounds = array<i64: 8, 8, 384>}, {pipeline_mode = #tpu.pipeline_mode<synchronous>, transform_indices = @transform_2, window_bounds = array<i64: 128, 384>}, {pipeline_mode = #tpu.pipeline_mode<synchronous>, transform_indices = @transform_3, window_bounds = array<i64: 1, 384>}, {pipeline_mode = #tpu.pipeline_mode<synchronous>, transform_indices = @transform_4, window_bounds = array<i64: 8, 128>}, {transform_indices = @transform_5, window_bounds = array<i64: 8, 8, 128>}, {pipeline_mode = #tpu.pipeline_mode<synchronous>, transform_indices = @transform_6, window_bounds = array<i64: 8, 128>}]} {
    %c0_i32 = arith.constant 0 : i32
    %0 = arith.cmpi eq, %arg0, %c0_i32 : i32
    %1 = arith.extui %0 : i1 to i32
    %c0_i32_0 = arith.constant 0 : i32
    %2 = arith.cmpi ne, %1, %c0_i32_0 : i32
    scf.if %2 {
      %c0_98 = arith.constant 0 : index
      %c0_99 = arith.constant 0 : index
      %362 = vector.load %arg5[%c0_98, %c0_99] : memref<8x128xf32, #tpu.memory_space<vmem>>, vector<8x128xf32>
      %c0_100 = arith.constant 0 : index
      %c0_101 = arith.constant 0 : index
      %363 = vector.load %arg8[%c0_100, %c0_101] : memref<8x128xf32, #tpu.memory_space<vmem>>, vector<8x128xf32>
      tpu.vector_store %arg8[%c0_100, %c0_101], %362 {strides = array<i32>} : memref<8x128xf32, #tpu.memory_space<vmem>>, vector<8x128xf32>,
    } else {
    }
    %c0 = arith.constant 0 : index
    %c0_1 = arith.constant 0 : index
    %3 = vector.load %arg1[%c0, %c0_1] : memref<8x1xi32, #tpu.memory_space<vmem>>, vector<8x1xi32>
    %c0_2 = arith.constant 0 : index
    %c0_3 = arith.constant 0 : index
    %4 = vector.load %arg4[%c0_2, %c0_3] : memref<1x384xf32, #tpu.memory_space<vmem>>, vector<1x384xf32>
    %c0_4 = arith.constant 0 : index
    %c0_5 = arith.constant 0 : index
    %5 = vector.load %arg8[%c0_4, %c0_5] : memref<8x128xf32, #tpu.memory_space<vmem>>, vector<8x128xf32>
    %c0_i32_6 = arith.constant 0 : i32
    %c8_i32 = arith.constant 8 : i32
    %6 = arith.muli %arg0, %c8_i32 : i32
    %7 = arith.addi %6, %c0_i32_6 : i32
    %8 = arith.index_cast %c0_i32_6 : i32 to index
    %c0_7 = arith.constant 0 : index
    %c0_8 = arith.constant 0 : index
    %9 = vector.load %arg2[%8, %c0_7, %c0_8] : memref<8x8x384xf32, #tpu.memory_space<vmem>>, vector<1x8x384xf32>
    %10 = vector.shape_cast %9 : vector<1x8x384xf32> to vector<8x384xf32>
    %c0_9 = arith.constant 0 : index
    %c0_10 = arith.constant 0 : index
    %11 = vector.load %arg3[%c0_9, %c0_10] : memref<128x384xf32, #tpu.memory_space<vmem>>, vector<128x384xf32>
    %cst = arith.constant dense<0.000000e+00> : vector<8x384xf32>
    %12 = tpu.matmul %5, %11, %cst {dimension_numbers = #tpu.dot_dimension_numbers<[1], [0], [0], [1], [0, 0, 1, 1], [], []>} : vector<8x128xf32>, vector<128x384xf32>, vector<8x384xf32> -> vector<8x384xf32>
    %13 = vector.broadcast %4 : vector<1x384xf32> to vector<8x384xf32>
    %14 = arith.addf %12, %13 : vector<8x384xf32>
    %15 = vector.extract_strided_slice %10 {offsets = [0, 0], sizes = [8, 128], strides = [1, 1]} : vector<8x384xf32> to vector<8x128xf32>
    %16 = vector.extract_strided_slice %10 {offsets = [0, 128], sizes = [8, 128], strides = [1, 1]} : vector<8x384xf32> to vector<8x128xf32>
    %17 = vector.extract_strided_slice %10 {offsets = [0, 256], sizes = [8, 128], strides = [1, 1]} : vector<8x384xf32> to vector<8x128xf32>
    %18 = vector.extract_strided_slice %14 {offsets = [0, 0], sizes = [8, 128], strides = [1, 1]} : vector<8x384xf32> to vector<8x128xf32>
    %19 = vector.extract_strided_slice %14 {offsets = [0, 128], sizes = [8, 128], strides = [1, 1]} : vector<8x384xf32> to vector<8x128xf32>
    %20 = vector.extract_strided_slice %14 {offsets = [0, 256], sizes = [8, 128], strides = [1, 1]} : vector<8x384xf32> to vector<8x128xf32>
    %21 = arith.addf %15, %18 : vector<8x128xf32>
    %22 = arith.negf %21 : vector<8x128xf32>
    %23 = math.exp %22 : vector<8x128xf32>
    %cst_11 = arith.constant 1.000000e+00 : f32
    %24 = vector.broadcast %cst_11 : f32 to vector<8x128xf32>
    %25 = arith.addf %24, %23 : vector<8x128xf32>
    %26 = arith.divf %24, %25 : vector<8x128xf32>
    %27 = arith.addf %16, %19 : vector<8x128xf32>
    %28 = arith.negf %27 : vector<8x128xf32>
    %29 = math.exp %28 : vector<8x128xf32>
    %cst_12 = arith.constant 1.000000e+00 : f32
    %30 = vector.broadcast %cst_12 : f32 to vector<8x128xf32>
    %31 = arith.addf %30, %29 : vector<8x128xf32>
    %32 = arith.divf %30, %31 : vector<8x128xf32>
    %33 = arith.mulf %26, %20 : vector<8x128xf32>
    %34 = arith.addf %17, %33 : vector<8x128xf32>
    %35 = math.tanh %34 : vector<8x128xf32>
    %cst_13 = arith.constant 1.000000e+00 : f32
    %36 = vector.broadcast %cst_13 : f32 to vector<8x128xf32>
    %37 = arith.subf %36, %32 : vector<8x128xf32>
    %38 = arith.mulf %37, %35 : vector<8x128xf32>
    %39 = arith.mulf %32, %5 : vector<8x128xf32>
    %40 = arith.addf %38, %39 : vector<8x128xf32>
    %41 = vector.broadcast %7 : i32 to vector<8x1xi32>
    %42 = arith.cmpi slt, %41, %3 : vector<8x1xi32>
    %43 = vector.shape_cast %42 : vector<8x1xi1> to vector<8x1xi1>
    %44 = vector.broadcast %43 : vector<8x1xi1> to vector<8x128xi1>
    %45 = arith.select %44, %40, %5 : vector<8x128xi1>, vector<8x128xf32>
    %46 = arith.index_cast %c0_i32_6 : i32 to index
    %c0_14 = arith.constant 0 : index
    %c0_15 = arith.constant 0 : index
    %47 = vector.load %arg6[%46, %c0_14, %c0_15] : memref<8x8x128xf32, #tpu.memory_space<vmem>>, vector<1x8x128xf32>
    %48 = vector.shape_cast %47 : vector<1x8x128xf32> to vector<8x128xf32>
    %49 = vector.shape_cast %45 : vector<8x128xf32> to vector<1x8x128xf32>
    tpu.vector_store %arg6[%46, %c0_14, %c0_15], %49 {strides = array<i32>} : memref<8x8x128xf32, #tpu.memory_space<vmem>>, vector<1x8x128xf32>,
    %c1_i32 = arith.constant 1 : i32
    %c8_i32_16 = arith.constant 8 : i32
    %50 = arith.muli %arg0, %c8_i32_16 : i32
    %51 = arith.addi %50, %c1_i32 : i32
    %52 = arith.index_cast %c1_i32 : i32 to index
    %c0_17 = arith.constant 0 : index
    %c0_18 = arith.constant 0 : index
    %53 = vector.load %arg2[%52, %c0_17, %c0_18] : memref<8x8x384xf32, #tpu.memory_space<vmem>>, vector<1x8x384xf32>
    %54 = vector.shape_cast %53 : vector<1x8x384xf32> to vector<8x384xf32>
    %c0_19 = arith.constant 0 : index
    %c0_20 = arith.constant 0 : index
    %55 = vector.load %arg3[%c0_19, %c0_20] : memref<128x384xf32, #tpu.memory_space<vmem>>, vector<128x384xf32>
    %cst_21 = arith.constant dense<0.000000e+00> : vector<8x384xf32>
    %56 = tpu.matmul %45, %55, %cst_21 {dimension_numbers = #tpu.dot_dimension_numbers<[1], [0], [0], [1], [0, 0, 1, 1], [], []>} : vector<8x128xf32>, vector<128x384xf32>, vector<8x384xf32> -> vector<8x384xf32>
    %57 = vector.broadcast %4 : vector<1x384xf32> to vector<8x384xf32>
    %58 = arith.addf %56, %57 : vector<8x384xf32>
    %59 = vector.extract_strided_slice %54 {offsets = [0, 0], sizes = [8, 128], strides = [1, 1]} : vector<8x384xf32> to vector<8x128xf32>
    %60 = vector.extract_strided_slice %54 {offsets = [0, 128], sizes = [8, 128], strides = [1, 1]} : vector<8x384xf32> to vector<8x128xf32>
    %61 = vector.extract_strided_slice %54 {offsets = [0, 256], sizes = [8, 128], strides = [1, 1]} : vector<8x384xf32> to vector<8x128xf32>
    %62 = vector.extract_strided_slice %58 {offsets = [0, 0], sizes = [8, 128], strides = [1, 1]} : vector<8x384xf32> to vector<8x128xf32>
    %63 = vector.extract_strided_slice %58 {offsets = [0, 128], sizes = [8, 128], strides = [1, 1]} : vector<8x384xf32> to vector<8x128xf32>
    %64 = vector.extract_strided_slice %58 {offsets = [0, 256], sizes = [8, 128], strides = [1, 1]} : vector<8x384xf32> to vector<8x128xf32>
    %65 = arith.addf %59, %62 : vector<8x128xf32>
    %66 = arith.negf %65 : vector<8x128xf32>
    %67 = math.exp %66 : vector<8x128xf32>
    %cst_22 = arith.constant 1.000000e+00 : f32
    %68 = vector.broadcast %cst_22 : f32 to vector<8x128xf32>
    %69 = arith.addf %68, %67 : vector<8x128xf32>
    %70 = arith.divf %68, %69 : vector<8x128xf32>
    %71 = arith.addf %60, %63 : vector<8x128xf32>
    %72 = arith.negf %71 : vector<8x128xf32>
    %73 = math.exp %72 : vector<8x128xf32>
    %cst_23 = arith.constant 1.000000e+00 : f32
    %74 = vector.broadcast %cst_23 : f32 to vector<8x128xf32>
    %75 = arith.addf %74, %73 : vector<8x128xf32>
    %76 = arith.divf %74, %75 : vector<8x128xf32>
    %77 = arith.mulf %70, %64 : vector<8x128xf32>
    %78 = arith.addf %61, %77 : vector<8x128xf32>
    %79 = math.tanh %78 : vector<8x128xf32>
    %cst_24 = arith.constant 1.000000e+00 : f32
    %80 = vector.broadcast %cst_24 : f32 to vector<8x128xf32>
    %81 = arith.subf %80, %76 : vector<8x128xf32>
    %82 = arith.mulf %81, %79 : vector<8x128xf32>
    %83 = arith.mulf %76, %45 : vector<8x128xf32>
    %84 = arith.addf %82, %83 : vector<8x128xf32>
    %85 = vector.broadcast %51 : i32 to vector<8x1xi32>
    %86 = arith.cmpi slt, %85, %3 : vector<8x1xi32>
    %87 = vector.shape_cast %86 : vector<8x1xi1> to vector<8x1xi1>
    %88 = vector.broadcast %87 : vector<8x1xi1> to vector<8x128xi1>
    %89 = arith.select %88, %84, %45 : vector<8x128xi1>, vector<8x128xf32>
    %90 = arith.index_cast %c1_i32 : i32 to index
    %c0_25 = arith.constant 0 : index
    %c0_26 = arith.constant 0 : index
    %91 = vector.load %arg6[%90, %c0_25, %c0_26] : memref<8x8x128xf32, #tpu.memory_space<vmem>>, vector<1x8x128xf32>
    %92 = vector.shape_cast %91 : vector<1x8x128xf32> to vector<8x128xf32>
    %93 = vector.shape_cast %89 : vector<8x128xf32> to vector<1x8x128xf32>
    tpu.vector_store %arg6[%90, %c0_25, %c0_26], %93 {strides = array<i32>} : memref<8x8x128xf32, #tpu.memory_space<vmem>>, vector<1x8x128xf32>,
    %c2_i32 = arith.constant 2 : i32
    %c8_i32_27 = arith.constant 8 : i32
    %94 = arith.muli %arg0, %c8_i32_27 : i32
    %95 = arith.addi %94, %c2_i32 : i32
    %96 = arith.index_cast %c2_i32 : i32 to index
    %c0_28 = arith.constant 0 : index
    %c0_29 = arith.constant 0 : index
    %97 = vector.load %arg2[%96, %c0_28, %c0_29] : memref<8x8x384xf32, #tpu.memory_space<vmem>>, vector<1x8x384xf32>
    %98 = vector.shape_cast %97 : vector<1x8x384xf32> to vector<8x384xf32>
    %c0_30 = arith.constant 0 : index
    %c0_31 = arith.constant 0 : index
    %99 = vector.load %arg3[%c0_30, %c0_31] : memref<128x384xf32, #tpu.memory_space<vmem>>, vector<128x384xf32>
    %cst_32 = arith.constant dense<0.000000e+00> : vector<8x384xf32>
    %100 = tpu.matmul %89, %99, %cst_32 {dimension_numbers = #tpu.dot_dimension_numbers<[1], [0], [0], [1], [0, 0, 1, 1], [], []>} : vector<8x128xf32>, vector<128x384xf32>, vector<8x384xf32> -> vector<8x384xf32>
    %101 = vector.broadcast %4 : vector<1x384xf32> to vector<8x384xf32>
    %102 = arith.addf %100, %101 : vector<8x384xf32>
    %103 = vector.extract_strided_slice %98 {offsets = [0, 0], sizes = [8, 128], strides = [1, 1]} : vector<8x384xf32> to vector<8x128xf32>
    %104 = vector.extract_strided_slice %98 {offsets = [0, 128], sizes = [8, 128], strides = [1, 1]} : vector<8x384xf32> to vector<8x128xf32>
    %105 = vector.extract_strided_slice %98 {offsets = [0, 256], sizes = [8, 128], strides = [1, 1]} : vector<8x384xf32> to vector<8x128xf32>
    %106 = vector.extract_strided_slice %102 {offsets = [0, 0], sizes = [8, 128], strides = [1, 1]} : vector<8x384xf32> to vector<8x128xf32>
    %107 = vector.extract_strided_slice %102 {offsets = [0, 128], sizes = [8, 128], strides = [1, 1]} : vector<8x384xf32> to vector<8x128xf32>
    %108 = vector.extract_strided_slice %102 {offsets = [0, 256], sizes = [8, 128], strides = [1, 1]} : vector<8x384xf32> to vector<8x128xf32>
    %109 = arith.addf %103, %106 : vector<8x128xf32>
    %110 = arith.negf %109 : vector<8x128xf32>
    %111 = math.exp %110 : vector<8x128xf32>
    %cst_33 = arith.constant 1.000000e+00 : f32
    %112 = vector.broadcast %cst_33 : f32 to vector<8x128xf32>
    %113 = arith.addf %112, %111 : vector<8x128xf32>
    %114 = arith.divf %112, %113 : vector<8x128xf32>
    %115 = arith.addf %104, %107 : vector<8x128xf32>
    %116 = arith.negf %115 : vector<8x128xf32>
    %117 = math.exp %116 : vector<8x128xf32>
    %cst_34 = arith.constant 1.000000e+00 : f32
    %118 = vector.broadcast %cst_34 : f32 to vector<8x128xf32>
    %119 = arith.addf %118, %117 : vector<8x128xf32>
    %120 = arith.divf %118, %119 : vector<8x128xf32>
    %121 = arith.mulf %114, %108 : vector<8x128xf32>
    %122 = arith.addf %105, %121 : vector<8x128xf32>
    %123 = math.tanh %122 : vector<8x128xf32>
    %cst_35 = arith.constant 1.000000e+00 : f32
    %124 = vector.broadcast %cst_35 : f32 to vector<8x128xf32>
    %125 = arith.subf %124, %120 : vector<8x128xf32>
    %126 = arith.mulf %125, %123 : vector<8x128xf32>
    %127 = arith.mulf %120, %89 : vector<8x128xf32>
    %128 = arith.addf %126, %127 : vector<8x128xf32>
    %129 = vector.broadcast %95 : i32 to vector<8x1xi32>
    %130 = arith.cmpi slt, %129, %3 : vector<8x1xi32>
    %131 = vector.shape_cast %130 : vector<8x1xi1> to vector<8x1xi1>
    %132 = vector.broadcast %131 : vector<8x1xi1> to vector<8x128xi1>
    %133 = arith.select %132, %128, %89 : vector<8x128xi1>, vector<8x128xf32>
    %134 = arith.index_cast %c2_i32 : i32 to index
    %c0_36 = arith.constant 0 : index
    %c0_37 = arith.constant 0 : index
    %135 = vector.load %arg6[%134, %c0_36, %c0_37] : memref<8x8x128xf32, #tpu.memory_space<vmem>>, vector<1x8x128xf32>
    %136 = vector.shape_cast %135 : vector<1x8x128xf32> to vector<8x128xf32>
    %137 = vector.shape_cast %133 : vector<8x128xf32> to vector<1x8x128xf32>
    tpu.vector_store %arg6[%134, %c0_36, %c0_37], %137 {strides = array<i32>} : memref<8x8x128xf32, #tpu.memory_space<vmem>>, vector<1x8x128xf32>,
    %c3_i32 = arith.constant 3 : i32
    %c8_i32_38 = arith.constant 8 : i32
    %138 = arith.muli %arg0, %c8_i32_38 : i32
    %139 = arith.addi %138, %c3_i32 : i32
    %140 = arith.index_cast %c3_i32 : i32 to index
    %c0_39 = arith.constant 0 : index
    %c0_40 = arith.constant 0 : index
    %141 = vector.load %arg2[%140, %c0_39, %c0_40] : memref<8x8x384xf32, #tpu.memory_space<vmem>>, vector<1x8x384xf32>
    %142 = vector.shape_cast %141 : vector<1x8x384xf32> to vector<8x384xf32>
    %c0_41 = arith.constant 0 : index
    %c0_42 = arith.constant 0 : index
    %143 = vector.load %arg3[%c0_41, %c0_42] : memref<128x384xf32, #tpu.memory_space<vmem>>, vector<128x384xf32>
    %cst_43 = arith.constant dense<0.000000e+00> : vector<8x384xf32>
    %144 = tpu.matmul %133, %143, %cst_43 {dimension_numbers = #tpu.dot_dimension_numbers<[1], [0], [0], [1], [0, 0, 1, 1], [], []>} : vector<8x128xf32>, vector<128x384xf32>, vector<8x384xf32> -> vector<8x384xf32>
    %145 = vector.broadcast %4 : vector<1x384xf32> to vector<8x384xf32>
    %146 = arith.addf %144, %145 : vector<8x384xf32>
    %147 = vector.extract_strided_slice %142 {offsets = [0, 0], sizes = [8, 128], strides = [1, 1]} : vector<8x384xf32> to vector<8x128xf32>
    %148 = vector.extract_strided_slice %142 {offsets = [0, 128], sizes = [8, 128], strides = [1, 1]} : vector<8x384xf32> to vector<8x128xf32>
    %149 = vector.extract_strided_slice %142 {offsets = [0, 256], sizes = [8, 128], strides = [1, 1]} : vector<8x384xf32> to vector<8x128xf32>
    %150 = vector.extract_strided_slice %146 {offsets = [0, 0], sizes = [8, 128], strides = [1, 1]} : vector<8x384xf32> to vector<8x128xf32>
    %151 = vector.extract_strided_slice %146 {offsets = [0, 128], sizes = [8, 128], strides = [1, 1]} : vector<8x384xf32> to vector<8x128xf32>
    %152 = vector.extract_strided_slice %146 {offsets = [0, 256], sizes = [8, 128], strides = [1, 1]} : vector<8x384xf32> to vector<8x128xf32>
    %153 = arith.addf %147, %150 : vector<8x128xf32>
    %154 = arith.negf %153 : vector<8x128xf32>
    %155 = math.exp %154 : vector<8x128xf32>
    %cst_44 = arith.constant 1.000000e+00 : f32
    %156 = vector.broadcast %cst_44 : f32 to vector<8x128xf32>
    %157 = arith.addf %156, %155 : vector<8x128xf32>
    %158 = arith.divf %156, %157 : vector<8x128xf32>
    %159 = arith.addf %148, %151 : vector<8x128xf32>
    %160 = arith.negf %159 : vector<8x128xf32>
    %161 = math.exp %160 : vector<8x128xf32>
    %cst_45 = arith.constant 1.000000e+00 : f32
    %162 = vector.broadcast %cst_45 : f32 to vector<8x128xf32>
    %163 = arith.addf %162, %161 : vector<8x128xf32>
    %164 = arith.divf %162, %163 : vector<8x128xf32>
    %165 = arith.mulf %158, %152 : vector<8x128xf32>
    %166 = arith.addf %149, %165 : vector<8x128xf32>
    %167 = math.tanh %166 : vector<8x128xf32>
    %cst_46 = arith.constant 1.000000e+00 : f32
    %168 = vector.broadcast %cst_46 : f32 to vector<8x128xf32>
    %169 = arith.subf %168, %164 : vector<8x128xf32>
    %170 = arith.mulf %169, %167 : vector<8x128xf32>
    %171 = arith.mulf %164, %133 : vector<8x128xf32>
    %172 = arith.addf %170, %171 : vector<8x128xf32>
    %173 = vector.broadcast %139 : i32 to vector<8x1xi32>
    %174 = arith.cmpi slt, %173, %3 : vector<8x1xi32>
    %175 = vector.shape_cast %174 : vector<8x1xi1> to vector<8x1xi1>
    %176 = vector.broadcast %175 : vector<8x1xi1> to vector<8x128xi1>
    %177 = arith.select %176, %172, %133 : vector<8x128xi1>, vector<8x128xf32>
    %178 = arith.index_cast %c3_i32 : i32 to index
    %c0_47 = arith.constant 0 : index
    %c0_48 = arith.constant 0 : index
    %179 = vector.load %arg6[%178, %c0_47, %c0_48] : memref<8x8x128xf32, #tpu.memory_space<vmem>>, vector<1x8x128xf32>
    %180 = vector.shape_cast %179 : vector<1x8x128xf32> to vector<8x128xf32>
    %181 = vector.shape_cast %177 : vector<8x128xf32> to vector<1x8x128xf32>
    tpu.vector_store %arg6[%178, %c0_47, %c0_48], %181 {strides = array<i32>} : memref<8x8x128xf32, #tpu.memory_space<vmem>>, vector<1x8x128xf32>,
    %c4_i32 = arith.constant 4 : i32
    %c8_i32_49 = arith.constant 8 : i32
    %182 = arith.muli %arg0, %c8_i32_49 : i32
    %183 = arith.addi %182, %c4_i32 : i32
    %184 = arith.index_cast %c4_i32 : i32 to index
    %c0_50 = arith.constant 0 : index
    %c0_51 = arith.constant 0 : index
    %185 = vector.load %arg2[%184, %c0_50, %c0_51] : memref<8x8x384xf32, #tpu.memory_space<vmem>>, vector<1x8x384xf32>
    %186 = vector.shape_cast %185 : vector<1x8x384xf32> to vector<8x384xf32>
    %c0_52 = arith.constant 0 : index
    %c0_53 = arith.constant 0 : index
    %187 = vector.load %arg3[%c0_52, %c0_53] : memref<128x384xf32, #tpu.memory_space<vmem>>, vector<128x384xf32>
    %cst_54 = arith.constant dense<0.000000e+00> : vector<8x384xf32>
    %188 = tpu.matmul %177, %187, %cst_54 {dimension_numbers = #tpu.dot_dimension_numbers<[1], [0], [0], [1], [0, 0, 1, 1], [], []>} : vector<8x128xf32>, vector<128x384xf32>, vector<8x384xf32> -> vector<8x384xf32>
    %189 = vector.broadcast %4 : vector<1x384xf32> to vector<8x384xf32>
    %190 = arith.addf %188, %189 : vector<8x384xf32>
    %191 = vector.extract_strided_slice %186 {offsets = [0, 0], sizes = [8, 128], strides = [1, 1]} : vector<8x384xf32> to vector<8x128xf32>
    %192 = vector.extract_strided_slice %186 {offsets = [0, 128], sizes = [8, 128], strides = [1, 1]} : vector<8x384xf32> to vector<8x128xf32>
    %193 = vector.extract_strided_slice %186 {offsets = [0, 256], sizes = [8, 128], strides = [1, 1]} : vector<8x384xf32> to vector<8x128xf32>
    %194 = vector.extract_strided_slice %190 {offsets = [0, 0], sizes = [8, 128], strides = [1, 1]} : vector<8x384xf32> to vector<8x128xf32>
    %195 = vector.extract_strided_slice %190 {offsets = [0, 128], sizes = [8, 128], strides = [1, 1]} : vector<8x384xf32> to vector<8x128xf32>
    %196 = vector.extract_strided_slice %190 {offsets = [0, 256], sizes = [8, 128], strides = [1, 1]} : vector<8x384xf32> to vector<8x128xf32>
    %197 = arith.addf %191, %194 : vector<8x128xf32>
    %198 = arith.negf %197 : vector<8x128xf32>
    %199 = math.exp %198 : vector<8x128xf32>
    %cst_55 = arith.constant 1.000000e+00 : f32
    %200 = vector.broadcast %cst_55 : f32 to vector<8x128xf32>
    %201 = arith.addf %200, %199 : vector<8x128xf32>
    %202 = arith.divf %200, %201 : vector<8x128xf32>
    %203 = arith.addf %192, %195 : vector<8x128xf32>
    %204 = arith.negf %203 : vector<8x128xf32>
    %205 = math.exp %204 : vector<8x128xf32>
    %cst_56 = arith.constant 1.000000e+00 : f32
    %206 = vector.broadcast %cst_56 : f32 to vector<8x128xf32>
    %207 = arith.addf %206, %205 : vector<8x128xf32>
    %208 = arith.divf %206, %207 : vector<8x128xf32>
    %209 = arith.mulf %202, %196 : vector<8x128xf32>
    %210 = arith.addf %193, %209 : vector<8x128xf32>
    %211 = math.tanh %210 : vector<8x128xf32>
    %cst_57 = arith.constant 1.000000e+00 : f32
    %212 = vector.broadcast %cst_57 : f32 to vector<8x128xf32>
    %213 = arith.subf %212, %208 : vector<8x128xf32>
    %214 = arith.mulf %213, %211 : vector<8x128xf32>
    %215 = arith.mulf %208, %177 : vector<8x128xf32>
    %216 = arith.addf %214, %215 : vector<8x128xf32>
    %217 = vector.broadcast %183 : i32 to vector<8x1xi32>
    %218 = arith.cmpi slt, %217, %3 : vector<8x1xi32>
    %219 = vector.shape_cast %218 : vector<8x1xi1> to vector<8x1xi1>
    %220 = vector.broadcast %219 : vector<8x1xi1> to vector<8x128xi1>
    %221 = arith.select %220, %216, %177 : vector<8x128xi1>, vector<8x128xf32>
    %222 = arith.index_cast %c4_i32 : i32 to index
    %c0_58 = arith.constant 0 : index
    %c0_59 = arith.constant 0 : index
    %223 = vector.load %arg6[%222, %c0_58, %c0_59] : memref<8x8x128xf32, #tpu.memory_space<vmem>>, vector<1x8x128xf32>
    %224 = vector.shape_cast %223 : vector<1x8x128xf32> to vector<8x128xf32>
    %225 = vector.shape_cast %221 : vector<8x128xf32> to vector<1x8x128xf32>
    tpu.vector_store %arg6[%222, %c0_58, %c0_59], %225 {strides = array<i32>} : memref<8x8x128xf32, #tpu.memory_space<vmem>>, vector<1x8x128xf32>,
    %c5_i32 = arith.constant 5 : i32
    %c8_i32_60 = arith.constant 8 : i32
    %226 = arith.muli %arg0, %c8_i32_60 : i32
    %227 = arith.addi %226, %c5_i32 : i32
    %228 = arith.index_cast %c5_i32 : i32 to index
    %c0_61 = arith.constant 0 : index
    %c0_62 = arith.constant 0 : index
    %229 = vector.load %arg2[%228, %c0_61, %c0_62] : memref<8x8x384xf32, #tpu.memory_space<vmem>>, vector<1x8x384xf32>
    %230 = vector.shape_cast %229 : vector<1x8x384xf32> to vector<8x384xf32>
    %c0_63 = arith.constant 0 : index
    %c0_64 = arith.constant 0 : index
    %231 = vector.load %arg3[%c0_63, %c0_64] : memref<128x384xf32, #tpu.memory_space<vmem>>, vector<128x384xf32>
    %cst_65 = arith.constant dense<0.000000e+00> : vector<8x384xf32>
    %232 = tpu.matmul %221, %231, %cst_65 {dimension_numbers = #tpu.dot_dimension_numbers<[1], [0], [0], [1], [0, 0, 1, 1], [], []>} : vector<8x128xf32>, vector<128x384xf32>, vector<8x384xf32> -> vector<8x384xf32>
    %233 = vector.broadcast %4 : vector<1x384xf32> to vector<8x384xf32>
    %234 = arith.addf %232, %233 : vector<8x384xf32>
    %235 = vector.extract_strided_slice %230 {offsets = [0, 0], sizes = [8, 128], strides = [1, 1]} : vector<8x384xf32> to vector<8x128xf32>
    %236 = vector.extract_strided_slice %230 {offsets = [0, 128], sizes = [8, 128], strides = [1, 1]} : vector<8x384xf32> to vector<8x128xf32>
    %237 = vector.extract_strided_slice %230 {offsets = [0, 256], sizes = [8, 128], strides = [1, 1]} : vector<8x384xf32> to vector<8x128xf32>
    %238 = vector.extract_strided_slice %234 {offsets = [0, 0], sizes = [8, 128], strides = [1, 1]} : vector<8x384xf32> to vector<8x128xf32>
    %239 = vector.extract_strided_slice %234 {offsets = [0, 128], sizes = [8, 128], strides = [1, 1]} : vector<8x384xf32> to vector<8x128xf32>
    %240 = vector.extract_strided_slice %234 {offsets = [0, 256], sizes = [8, 128], strides = [1, 1]} : vector<8x384xf32> to vector<8x128xf32>
    %241 = arith.addf %235, %238 : vector<8x128xf32>
    %242 = arith.negf %241 : vector<8x128xf32>
    %243 = math.exp %242 : vector<8x128xf32>
    %cst_66 = arith.constant 1.000000e+00 : f32
    %244 = vector.broadcast %cst_66 : f32 to vector<8x128xf32>
    %245 = arith.addf %244, %243 : vector<8x128xf32>
    %246 = arith.divf %244, %245 : vector<8x128xf32>
    %247 = arith.addf %236, %239 : vector<8x128xf32>
    %248 = arith.negf %247 : vector<8x128xf32>
    %249 = math.exp %248 : vector<8x128xf32>
    %cst_67 = arith.constant 1.000000e+00 : f32
    %250 = vector.broadcast %cst_67 : f32 to vector<8x128xf32>
    %251 = arith.addf %250, %249 : vector<8x128xf32>
    %252 = arith.divf %250, %251 : vector<8x128xf32>
    %253 = arith.mulf %246, %240 : vector<8x128xf32>
    %254 = arith.addf %237, %253 : vector<8x128xf32>
    %255 = math.tanh %254 : vector<8x128xf32>
    %cst_68 = arith.constant 1.000000e+00 : f32
    %256 = vector.broadcast %cst_68 : f32 to vector<8x128xf32>
    %257 = arith.subf %256, %252 : vector<8x128xf32>
    %258 = arith.mulf %257, %255 : vector<8x128xf32>
    %259 = arith.mulf %252, %221 : vector<8x128xf32>
    %260 = arith.addf %258, %259 : vector<8x128xf32>
    %261 = vector.broadcast %227 : i32 to vector<8x1xi32>
    %262 = arith.cmpi slt, %261, %3 : vector<8x1xi32>
    %263 = vector.shape_cast %262 : vector<8x1xi1> to vector<8x1xi1>
    %264 = vector.broadcast %263 : vector<8x1xi1> to vector<8x128xi1>
    %265 = arith.select %264, %260, %221 : vector<8x128xi1>, vector<8x128xf32>
    %266 = arith.index_cast %c5_i32 : i32 to index
    %c0_69 = arith.constant 0 : index
    %c0_70 = arith.constant 0 : index
    %267 = vector.load %arg6[%266, %c0_69, %c0_70] : memref<8x8x128xf32, #tpu.memory_space<vmem>>, vector<1x8x128xf32>
    %268 = vector.shape_cast %267 : vector<1x8x128xf32> to vector<8x128xf32>
    %269 = vector.shape_cast %265 : vector<8x128xf32> to vector<1x8x128xf32>
    tpu.vector_store %arg6[%266, %c0_69, %c0_70], %269 {strides = array<i32>} : memref<8x8x128xf32, #tpu.memory_space<vmem>>, vector<1x8x128xf32>,
    %c6_i32 = arith.constant 6 : i32
    %c8_i32_71 = arith.constant 8 : i32
    %270 = arith.muli %arg0, %c8_i32_71 : i32
    %271 = arith.addi %270, %c6_i32 : i32
    %272 = arith.index_cast %c6_i32 : i32 to index
    %c0_72 = arith.constant 0 : index
    %c0_73 = arith.constant 0 : index
    %273 = vector.load %arg2[%272, %c0_72, %c0_73] : memref<8x8x384xf32, #tpu.memory_space<vmem>>, vector<1x8x384xf32>
    %274 = vector.shape_cast %273 : vector<1x8x384xf32> to vector<8x384xf32>
    %c0_74 = arith.constant 0 : index
    %c0_75 = arith.constant 0 : index
    %275 = vector.load %arg3[%c0_74, %c0_75] : memref<128x384xf32, #tpu.memory_space<vmem>>, vector<128x384xf32>
    %cst_76 = arith.constant dense<0.000000e+00> : vector<8x384xf32>
    %276 = tpu.matmul %265, %275, %cst_76 {dimension_numbers = #tpu.dot_dimension_numbers<[1], [0], [0], [1], [0, 0, 1, 1], [], []>} : vector<8x128xf32>, vector<128x384xf32>, vector<8x384xf32> -> vector<8x384xf32>
    %277 = vector.broadcast %4 : vector<1x384xf32> to vector<8x384xf32>
    %278 = arith.addf %276, %277 : vector<8x384xf32>
    %279 = vector.extract_strided_slice %274 {offsets = [0, 0], sizes = [8, 128], strides = [1, 1]} : vector<8x384xf32> to vector<8x128xf32>
    %280 = vector.extract_strided_slice %274 {offsets = [0, 128], sizes = [8, 128], strides = [1, 1]} : vector<8x384xf32> to vector<8x128xf32>
    %281 = vector.extract_strided_slice %274 {offsets = [0, 256], sizes = [8, 128], strides = [1, 1]} : vector<8x384xf32> to vector<8x128xf32>
    %282 = vector.extract_strided_slice %278 {offsets = [0, 0], sizes = [8, 128], strides = [1, 1]} : vector<8x384xf32> to vector<8x128xf32>
    %283 = vector.extract_strided_slice %278 {offsets = [0, 128], sizes = [8, 128], strides = [1, 1]} : vector<8x384xf32> to vector<8x128xf32>
    %284 = vector.extract_strided_slice %278 {offsets = [0, 256], sizes = [8, 128], strides = [1, 1]} : vector<8x384xf32> to vector<8x128xf32>
    %285 = arith.addf %279, %282 : vector<8x128xf32>
    %286 = arith.negf %285 : vector<8x128xf32>
    %287 = math.exp %286 : vector<8x128xf32>
    %cst_77 = arith.constant 1.000000e+00 : f32
    %288 = vector.broadcast %cst_77 : f32 to vector<8x128xf32>
    %289 = arith.addf %288, %287 : vector<8x128xf32>
    %290 = arith.divf %288, %289 : vector<8x128xf32>
    %291 = arith.addf %280, %283 : vector<8x128xf32>
    %292 = arith.negf %291 : vector<8x128xf32>
    %293 = math.exp %292 : vector<8x128xf32>
    %cst_78 = arith.constant 1.000000e+00 : f32
    %294 = vector.broadcast %cst_78 : f32 to vector<8x128xf32>
    %295 = arith.addf %294, %293 : vector<8x128xf32>
    %296 = arith.divf %294, %295 : vector<8x128xf32>
    %297 = arith.mulf %290, %284 : vector<8x128xf32>
    %298 = arith.addf %281, %297 : vector<8x128xf32>
    %299 = math.tanh %298 : vector<8x128xf32>
    %cst_79 = arith.constant 1.000000e+00 : f32
    %300 = vector.broadcast %cst_79 : f32 to vector<8x128xf32>
    %301 = arith.subf %300, %296 : vector<8x128xf32>
    %302 = arith.mulf %301, %299 : vector<8x128xf32>
    %303 = arith.mulf %296, %265 : vector<8x128xf32>
    %304 = arith.addf %302, %303 : vector<8x128xf32>
    %305 = vector.broadcast %271 : i32 to vector<8x1xi32>
    %306 = arith.cmpi slt, %305, %3 : vector<8x1xi32>
    %307 = vector.shape_cast %306 : vector<8x1xi1> to vector<8x1xi1>
    %308 = vector.broadcast %307 : vector<8x1xi1> to vector<8x128xi1>
    %309 = arith.select %308, %304, %265 : vector<8x128xi1>, vector<8x128xf32>
    %310 = arith.index_cast %c6_i32 : i32 to index
    %c0_80 = arith.constant 0 : index
    %c0_81 = arith.constant 0 : index
    %311 = vector.load %arg6[%310, %c0_80, %c0_81] : memref<8x8x128xf32, #tpu.memory_space<vmem>>, vector<1x8x128xf32>
    %312 = vector.shape_cast %311 : vector<1x8x128xf32> to vector<8x128xf32>
    %313 = vector.shape_cast %309 : vector<8x128xf32> to vector<1x8x128xf32>
    tpu.vector_store %arg6[%310, %c0_80, %c0_81], %313 {strides = array<i32>} : memref<8x8x128xf32, #tpu.memory_space<vmem>>, vector<1x8x128xf32>,
    %c7_i32 = arith.constant 7 : i32
    %c8_i32_82 = arith.constant 8 : i32
    %314 = arith.muli %arg0, %c8_i32_82 : i32
    %315 = arith.addi %314, %c7_i32 : i32
    %316 = arith.index_cast %c7_i32 : i32 to index
    %c0_83 = arith.constant 0 : index
    %c0_84 = arith.constant 0 : index
    %317 = vector.load %arg2[%316, %c0_83, %c0_84] : memref<8x8x384xf32, #tpu.memory_space<vmem>>, vector<1x8x384xf32>
    %318 = vector.shape_cast %317 : vector<1x8x384xf32> to vector<8x384xf32>
    %c0_85 = arith.constant 0 : index
    %c0_86 = arith.constant 0 : index
    %319 = vector.load %arg3[%c0_85, %c0_86] : memref<128x384xf32, #tpu.memory_space<vmem>>, vector<128x384xf32>
    %cst_87 = arith.constant dense<0.000000e+00> : vector<8x384xf32>
    %320 = tpu.matmul %309, %319, %cst_87 {dimension_numbers = #tpu.dot_dimension_numbers<[1], [0], [0], [1], [0, 0, 1, 1], [], []>} : vector<8x128xf32>, vector<128x384xf32>, vector<8x384xf32> -> vector<8x384xf32>
    %321 = vector.broadcast %4 : vector<1x384xf32> to vector<8x384xf32>
    %322 = arith.addf %320, %321 : vector<8x384xf32>
    %323 = vector.extract_strided_slice %318 {offsets = [0, 0], sizes = [8, 128], strides = [1, 1]} : vector<8x384xf32> to vector<8x128xf32>
    %324 = vector.extract_strided_slice %318 {offsets = [0, 128], sizes = [8, 128], strides = [1, 1]} : vector<8x384xf32> to vector<8x128xf32>
    %325 = vector.extract_strided_slice %318 {offsets = [0, 256], sizes = [8, 128], strides = [1, 1]} : vector<8x384xf32> to vector<8x128xf32>
    %326 = vector.extract_strided_slice %322 {offsets = [0, 0], sizes = [8, 128], strides = [1, 1]} : vector<8x384xf32> to vector<8x128xf32>
    %327 = vector.extract_strided_slice %322 {offsets = [0, 128], sizes = [8, 128], strides = [1, 1]} : vector<8x384xf32> to vector<8x128xf32>
    %328 = vector.extract_strided_slice %322 {offsets = [0, 256], sizes = [8, 128], strides = [1, 1]} : vector<8x384xf32> to vector<8x128xf32>
    %329 = arith.addf %323, %326 : vector<8x128xf32>
    %330 = arith.negf %329 : vector<8x128xf32>
    %331 = math.exp %330 : vector<8x128xf32>
    %cst_88 = arith.constant 1.000000e+00 : f32
    %332 = vector.broadcast %cst_88 : f32 to vector<8x128xf32>
    %333 = arith.addf %332, %331 : vector<8x128xf32>
    %334 = arith.divf %332, %333 : vector<8x128xf32>
    %335 = arith.addf %324, %327 : vector<8x128xf32>
    %336 = arith.negf %335 : vector<8x128xf32>
    %337 = math.exp %336 : vector<8x128xf32>
    %cst_89 = arith.constant 1.000000e+00 : f32
    %338 = vector.broadcast %cst_89 : f32 to vector<8x128xf32>
    %339 = arith.addf %338, %337 : vector<8x128xf32>
    %340 = arith.divf %338, %339 : vector<8x128xf32>
    %341 = arith.mulf %334, %328 : vector<8x128xf32>
    %342 = arith.addf %325, %341 : vector<8x128xf32>
    %343 = math.tanh %342 : vector<8x128xf32>
    %cst_90 = arith.constant 1.000000e+00 : f32
    %344 = vector.broadcast %cst_90 : f32 to vector<8x128xf32>
    %345 = arith.subf %344, %340 : vector<8x128xf32>
    %346 = arith.mulf %345, %343 : vector<8x128xf32>
    %347 = arith.mulf %340, %309 : vector<8x128xf32>
    %348 = arith.addf %346, %347 : vector<8x128xf32>
    %349 = vector.broadcast %315 : i32 to vector<8x1xi32>
    %350 = arith.cmpi slt, %349, %3 : vector<8x1xi32>
    %351 = vector.shape_cast %350 : vector<8x1xi1> to vector<8x1xi1>
    %352 = vector.broadcast %351 : vector<8x1xi1> to vector<8x128xi1>
    %353 = arith.select %352, %348, %309 : vector<8x128xi1>, vector<8x128xf32>
    %354 = arith.index_cast %c7_i32 : i32 to index
    %c0_91 = arith.constant 0 : index
    %c0_92 = arith.constant 0 : index
    %355 = vector.load %arg6[%354, %c0_91, %c0_92] : memref<8x8x128xf32, #tpu.memory_space<vmem>>, vector<1x8x128xf32>
    %356 = vector.shape_cast %355 : vector<1x8x128xf32> to vector<8x128xf32>
    %357 = vector.shape_cast %353 : vector<8x128xf32> to vector<1x8x128xf32>
    tpu.vector_store %arg6[%354, %c0_91, %c0_92], %357 {strides = array<i32>} : memref<8x8x128xf32, #tpu.memory_space<vmem>>, vector<1x8x128xf32>,
    %c8_i32_93 = arith.constant 8 : i32
    %c0_94 = arith.constant 0 : index
    %c0_95 = arith.constant 0 : index
    %358 = vector.load %arg8[%c0_94, %c0_95] : memref<8x128xf32, #tpu.memory_space<vmem>>, vector<8x128xf32>
    tpu.vector_store %arg8[%c0_94, %c0_95], %353 {strides = array<i32>} : memref<8x128xf32, #tpu.memory_space<vmem>>, vector<8x128xf32>,
    %c0_i32_96 = arith.constant 0 : i32
    %359 = arith.cmpi eq, %arg0, %c0_i32_96 : i32
    %360 = arith.extui %359 : i1 to i32
    %c0_i32_97 = arith.constant 0 : i32
    %361 = arith.cmpi ne, %360, %c0_i32_97 : i32
    scf.if %361 {
      %c0_98 = arith.constant 0 : index
      %c0_99 = arith.constant 0 : index
      %362 = vector.load %arg7[%c0_98, %c0_99] : memref<8x128xf32, #tpu.memory_space<vmem>>, vector<8x128xf32>
      tpu.vector_store %arg7[%c0_98, %c0_99], %353 {strides = array<i32>} : memref<8x128xf32, #tpu.memory_space<vmem>>, vector<8x128xf32>,
    } else {
    }
    return
  }
  func.func @transform_0(%arg0: i32) -> (i32, i32) {
    %c0_i32 = arith.constant 0 : i32
    %c0_i32_0 = arith.constant 0 : i32
    %c0_i32_1 = arith.constant 0 : i32
    return %c0_i32, %c0_i32_0 : i32, i32
  }
  func.func @transform_1(%arg0: i32) -> (i32, i32, i32) {
    %c0_i32 = arith.constant 0 : i32
    %c0_i32_0 = arith.constant 0 : i32
    %c0_i32_1 = arith.constant 0 : i32
    return %arg0, %c0_i32, %c0_i32_0 : i32, i32, i32
  }
  func.func @transform_2(%arg0: i32) -> (i32, i32) {
    %c0_i32 = arith.constant 0 : i32
    %c0_i32_0 = arith.constant 0 : i32
    %c0_i32_1 = arith.constant 0 : i32
    return %c0_i32, %c0_i32_0 : i32, i32
  }
  func.func @transform_3(%arg0: i32) -> (i32, i32) {
    %c0_i32 = arith.constant 0 : i32
    %c0_i32_0 = arith.constant 0 : i32
    %c0_i32_1 = arith.constant 0 : i32
    return %c0_i32, %c0_i32_0 : i32, i32
  }
  func.func @transform_4(%arg0: i32) -> (i32, i32) {
    %c0_i32 = arith.constant 0 : i32
    %c0_i32_0 = arith.constant 0 : i32
    %c0_i32_1 = arith.constant 0 : i32
    return %c0_i32, %c0_i32_0 : i32, i32
  }
  func.func @transform_5(%arg0: i32) -> (i32, i32, i32) {
    %c0_i32 = arith.constant 0 : i32
    %c0_i32_0 = arith.constant 0 : i32
    %c0_i32_1 = arith.constant 0 : i32
    return %arg0, %c0_i32, %c0_i32_0 : i32, i32, i32
  }
  func.func @transform_6(%arg0: i32) -> (i32, i32) {
    %c0_i32 = arith.constant 0 : i32
    %c0_i32_0 = arith.constant 0 : i32
    %c0_i32_1 = arith.constant 0 : i32
    return %c0_i32, %c0_i32_0 : i32, i32
  }
}

</mosaic_0001>

<bundles_post_ra>
// kernel: tpu_custom_call.1
= control target key start
LH: loop header
LB: loop body
LE: loop exit
PB: predicated region body
PF: predicated region fallthrough
CT: control target
= control target key end

     0   :  { %12 = vsyncpa [#allocation4], 0  ;;  %s3575_s0 = inlined_call_operand.vmem [shape: s32[8,1], index: 0, kind: input, shape index: {}]   ;;  %s3576_s1 = inlined_call_operand.hbm [shape: f32[8,8,384], index: 1, kind: input, shape index: {}]   ;;  %s3577_s2 = inlined_call_operand.hbm [shape: f32[128,384], index: 2, kind: input, shape index: {}]   ;;  %s3578_s3 = inlined_call_operand.vmem [shape: f32[1,384], index: 3, kind: input, shape index: {}]   ;;  %s3579_s4 = inlined_call_operand.vmem [shape: f32[8,128], index: 4, kind: input, shape index: {}]   ;;  %s3580_s5 = inlined_call_operand.hbm [shape: f32[8,8,128], index: 5, kind: output, shape index: {0}]   ;;  %s3581_s6 = inlined_call_operand.hbm [shape: f32[8,128], index: 6, kind: output, shape index: {1}]  }
   0x1   :  { %13 = vsyncpa [#allocation7], 0 }
   0x2   :  { %14 = vsyncpa [#allocation5], 0 }
   0x3   :  { %15 = vsyncpa [#allocation10], 0  ;;  %s2990_s21 = smov [#allocation3]   ;;  %s2894_s25 = scalar_lea.hbm %s3576_s1, 3072 }
   0x4   :  { %s23_s22 = sshll.u32 %s2990_s21, 4  ;;  %p2895_p0 = scmp.ne.s32.totalorder %s3576_s1, %s2894_s25  ;;  %s24_s22 = int_to_ptr.vmem [resolvable:$true] %s23_s22 }
   0x5   :  { %p2898_p1 = scmp.lt.u32.totalorder %s2894_s25, %s3576_s1 }
   0x7   :  { %p2900_p2 = pnand %p2898_p1, %p2895_p0 }
   0x9   :  { %2903 = shalt.err (!%p2900_p2)
}
   0xa   :  { %s2904_s30 = scalar_lea.vmem %s24_s22, 3072  ;;  %p2909_p4 = scmp.lt.s32.totalorder %s24_s22, %s24_s22 }
   0xb   :  { %p2905_p3 = scmp.ne.s32.totalorder %s24_s22, %s2904_s30  ;;  %p2910_p5 = scmp.lt.s32.totalorder %s2904_s30, %s2904_s30 }
   0xd   :  { %p2911_p6 = por %p2910_p5, %p2909_p4 }
   0xf   :  { %p2912_p7 = pnand %p2911_p6, %p2905_p3 }
  0x11   :  { %2915 = shalt.err (!%p2912_p7)
}
  0x12   :  { %s2991_s7 = smov 384   ;;  %s2992_s8 = smov 24  }
  0x13   :  { %29 = dma.hbm_to_vmem [thread:$0]  %s3576_s1, 3072, %s24_s22, [#allocation4], %s2991_s7, %s2991_s7, %s2992_s8  }
  0x14   :  { %s2993_s11 = smov [#allocation6]   ;;  %s2916_s15 = scalar_lea.hbm %s3577_s2, 6144 }
  0x15   :  { %s35_s12 = sshll.u32 %s2993_s11, 4  ;;  %p2917_p8 = scmp.ne.s32.totalorder %s3577_s2, %s2916_s15  ;;  %s36_s12 = int_to_ptr.vmem [resolvable:$true] %s35_s12 }
  0x16   :  { %p2920_p9 = scmp.lt.u32.totalorder %s2916_s15, %s3577_s2 }
  0x18   :  { %p2922_p10 = pnand %p2920_p9, %p2917_p8 }
  0x1a   :  { %2925 = shalt.err (!%p2922_p10)
}
  0x1b   :  { %s2926_s20 = scalar_lea.vmem %s36_s12, 6144  ;;  %p2931_p12 = scmp.lt.s32.totalorder %s36_s12, %s36_s12 }
  0x1c   :  { %p2927_p11 = scmp.ne.s32.totalorder %s36_s12, %s2926_s20  ;;  %p2932_p13 = scmp.lt.s32.totalorder %s2926_s20, %s2926_s20 }
  0x1e   :  { %p2933_p0 = por %p2932_p13, %p2931_p12 }
  0x20   :  { %p2934_p1 = pnand %p2933_p0, %p2927_p11 }
  0x22   :  { %2937 = shalt.err (!%p2934_p1)
}
  0x23   :  { %41 = dma.hbm_to_vmem [thread:$0]  %s3577_s2, 6144, %s36_s12, [#allocation7], %s2991_s7, %s2991_s7, %s2992_s8  }
  0x24   :  { %2982 = dma.done.wait [#allocation4], 3072  }
  0x25   :  { %2983 = vsyncadd [#allocation4], 4294964224 }
  0x26   :  { %2984 = dma.done.wait [#allocation7], 6144  }
  0x27   :  { %2985 = vsyncadd [#allocation7], 4294961152  ;;  %v2994_v0 = vmov 0.0|0.0   ;;  %v2995_v1 = vmov 0.0   ;;  %vm2996_vm0 = vmmov 0   ;;  %v2997_v2 = vmov 0  }
  0x28   :  { %2384 = vmatprep.subr.bf16.mxu1 %v2994_v0  ;;  %193 = vmatprep.mubr.f32.mxu0 %v2995_v1  ;;  %v66_v3 = vld [vmem:[#allocation6 + $0x8] sm:$0xff]  ;;  %v69_v4 = vld [vmem:[#allocation6 + $0x20] sm:$0xff]  ;;  %v68_v7 = vld [vmem:[#allocation6 + $0x18] sm:$0xff]  ;;  %s2999_s26 = smov [#allocation9]  }
  0x29   :  { %2104 = vmatprep.mubr.msk.f32.mxu1 %vm2996_vm0, %v2995_v1  ;;  %2812 = vset.pattern.permute.xlu0 %v2997_v2  ;;  %v65_v5 = vld [vmem:[#allocation6] sm:$0xff]  ;;  %v3067_v6 = vpack.c.bf16 %v69_v4, %v66_v3  ;;  %v72_v8 = vld [vmem:[#allocation6 + $0x38] sm:$0xff]  ;;  %v75_v9 = vld [vmem:[#allocation6 + $0x50] sm:$0xff]  ;;  %s1898_s27 = sshll.u32 %s2999_s26, 4  ;;  %s3544_s27 = int_to_ptr.vmem [resolvable:$true] %s1898_s27 }
  0x2a   :  { %2813 = vset.pattern.permute.xlu1 %v2997_v2  ;;  %v3069_v10 = vpack.c.bf16 %v68_v7, %v65_v5  ;;  %v3071_v11 = vpack.c.bf16 %v75_v9, %v72_v8  ;;  %v71_v12 = vld [vmem:[#allocation6 + $0x30] sm:$0xff]  ;;  %v74_v13 = vld [vmem:[#allocation6 + $0x48] sm:$0xff]  ;;  %v81_v15 = vld [vmem:[#allocation6 + $0x80] sm:$0xff] }
  0x2b   :  { %v78_v14 = vld [vmem:[#allocation6 + $0x68] sm:$0xff]  ;;  %2353 = vmatprep.subr.bf16.mxu0 %v3067_v6  ;;  %v3075_v16 = vpack.c.bf16 %v74_v13, %v71_v12  ;;  %v77_v18 = vld [vmem:[#allocation6 + $0x60] sm:$0xff]  ;;  %v80_v19 = vld [vmem:[#allocation6 + $0x78] sm:$0xff] }
  0x2c   :  { %2355 = vmatpush1.bf16.msra.mxu0 %v3069_v10  ;;  %v3078_v17 = vpack.c.bf16 %v81_v15, %v78_v14  ;;  %v84_v20 = vld [vmem:[#allocation6 + $0x98] sm:$0xff]  ;;  %v87_v21 = vld [vmem:[#allocation6 + $0xb0] sm:$0xff]  ;;  %v3081_v22 = vpack.c.bf16 %v80_v19, %v77_v18  ;;  %v86_v25 = vld [vmem:[#allocation6 + $0xa8] sm:$0xff] }
  0x2d   :  { %2357 = vmatprep.subr.bf16.mxu0 %v3071_v11  ;;  %v3084_v23 = vpack.c.bf16 %v87_v21, %v84_v20  ;;  %v83_v24 = vld [vmem:[#allocation6 + $0x90] sm:$0xff]  ;;  %v90_v26 = vld [vmem:[#allocation6 + $0xc8] sm:$0xff]  ;;  %v93_v27 = vld [vmem:[#allocation6 + $0xe0] sm:$0xff] }
  0x2e   :  { %v67_v28 = vld [vmem:[#allocation6 + $0x10] sm:$0xff]  ;;  %v70_v29 = vld [vmem:[#allocation6 + $0x28] sm:$0xff]  ;;  %v73_v31 = vld [vmem:[#allocation6 + $0x40] sm:$0xff]  ;;  %v3089_v32 = vpack.c.bf16 %v86_v25, %v83_v24  ;;  %v3092_v34 = vpack.c.bf16 %v93_v27, %v90_v26  ;;  %v114_v27 = vlaneseq }
  0x2f   :  { %v3086_v30 = vpack.c.bf16 %v70_v29, %v67_v28  ;;  %v76_v33 = vld [vmem:[#allocation6 + $0x58] sm:$0xff]  ;;  %v89_v35 = vld [vmem:[#allocation6 + $0xc0] sm:$0xff]  ;;  %v99_v39 = vld [vmem:[#allocation6 + $0x110] sm:$0xff] }
  0x30   :  { %2359 = vmatpush1.bf16.msra.mxu0 %v3075_v16  ;;  %v92_v36 = vld [vmem:[#allocation6 + $0xd8] sm:$0xff]  ;;  %v3095_v38 = vpack.c.bf16 %v76_v33, %v73_v31  ;;  %v79_v40 = vld [vmem:[#allocation6 + $0x70] sm:$0xff]  ;;  %v82_v41 = vld [vmem:[#allocation6 + $0x88] sm:$0xff]  ;;  %v115_v28 = vshrl.u32 %v114_v27, 7 }
  0x31   :  { %2361 = vmatprep.subr.bf16.mxu0 %v3078_v17  ;;  %v96_v37 = vld [vmem:[#allocation6 + $0xf8] sm:$0xff]  ;;  %2386 = vmatpush3.bf16.msra.mxu1 %v3086_v30  ;;  %v3099_v42 = vpack.c.bf16 %v92_v36, %v89_v35  ;;  %v95_v45 = vld [vmem:[#allocation6 + $0xf0] sm:$0xff]  ;;  %v98_v46 = vld [vmem:[#allocation6 + $0x108] sm:$0xff]  ;;  %v3110_v48 = vpack.c.bf16 %v82_v41, %v79_v40 }
  0x32   :  { %2387 = vmatprep.subr.bf16.mxu1 %v2994_v0  ;;  %v3104_v43 = vld [vmem:[%s3575_s0] sm:$0xff]  ;;  %v3107_v44 = vpack.c.bf16 %v99_v39, %v96_v37  ;;  %v102_v47 = vld [vmem:[#allocation6 + $0x128] sm:$0xff]  ;;  %v105_v49 = vld [vmem:[#allocation6 + $0x140] sm:$0xff]  ;;  %v3117_v53 = vpack.c.bf16 %v98_v46, %v95_v45  ;;  %v116_v29 = vsub.s32 0, %v115_v28  ;;  %v120_v33 = vsub.s32 1, %v115_v28 }
  0x33   :  { %vm1914_vm1 = vcmp.gt.s32.totalorder %v3104_v43, 0  ;;  %vm1917_vm2 = vcmp.gt.s32.totalorder %v3104_v43, 1  ;;  %v85_v50 = vld [vmem:[#allocation6 + $0xa0] sm:$0xff]  ;;  %v88_v51 = vld [vmem:[#allocation6 + $0xb8] sm:$0xff]  ;;  %v3121_v55 = vpack.c.bf16 %v105_v49, %v102_v47  ;;  %vm1926_vm3 = vcmp.gt.s32.totalorder %v3104_v43, 4  ;;  %v111_v60 = vld [vmem:[#allocation6 + $0x170] sm:$0xff] }
  0x34   :  { %2363 = vmatpush1.bf16.msra.mxu0 %v3081_v22  ;;  %v293_v52 = vsel %vm1914_vm1, 1, %v2997_v2  ;;  %v517_v54 = vsel %vm1917_vm2, 1, %v2997_v2  ;;  %v101_v56 = vld [vmem:[#allocation6 + $0x120] sm:$0xff]  ;;  %v104_v57 = vld [vmem:[#allocation6 + $0x138] sm:$0xff]  ;;  %v3124_v59 = vpack.c.bf16 %v88_v51, %v85_v50  ;;  %v91_v61 = vld [vmem:[#allocation6 + $0xd0] sm:$0xff]  ;;  %v1192_v3 = vsel %vm1926_vm3, 1, %v2997_v2 }
  0x35   :  { %2365 = vmatprep.subr.bf16.mxu0 %v3084_v23  ;;  %2389 = vmatpush3.bf16.msra.mxu1 %v3095_v38  ;;  %v108_v58 = vld [vmem:[#allocation6 + $0x158] sm:$0xff]  ;;  %v94_v62 = vld [vmem:[#allocation6 + $0xe8] sm:$0xff]  ;;  %v3129_v63 = vpack.c.bf16 %v104_v57, %v101_v56  ;;  %v107_v5 = vld [vmem:[#allocation6 + $0x150] sm:$0xff]  ;;  %vm1932_vm4 = vcmp.gt.s32.totalorder %v3104_v43, 6  ;;  %vm1920_vm6 = vcmp.gt.s32.totalorder %v3104_v43, 2  ;;  %vm1923_vm7 = vcmp.gt.s32.totalorder %v3104_v43, 3 }
  0x36   :  { %2390 = vmatprep.subr.bf16.mxu1 %v2994_v0  ;;  %295 = vperm.xlu0 %2812, %v293_v52   ;;  %v3133_v4 = vpack.c.bf16 %v111_v60, %v108_v58  ;;  %v110_v7 = vld [vmem:[#allocation6 + $0x168] sm:$0xff]  ;;  %v3136_v8 = vpack.c.bf16 %v94_v62, %v91_v61  ;;  %v97_v9 = vld [vmem:[#allocation6 + $0x100] sm:$0xff]  ;;  %v100_v12 = vld [vmem:[#allocation6 + $0x118] sm:$0xff]  ;;  %v1642_v14 = vsel %vm1932_vm4, 1, %v2997_v2  ;;  %v124_v58 = vsub.s32 2, %v115_v28 }
  0x37   :  { %v3141_v13 = vpack.c.bf16 %v110_v7, %v107_v5  ;;  %v3146_v15 = vpack.c.bf16 %v100_v12, %v97_v9  ;;  %v103_v18 = vld [vmem:[#allocation6 + $0x130] sm:$0xff]  ;;  %v106_v19 = vld [vmem:[#allocation6 + $0x148] sm:$0xff]  ;;  %v3153_v20 = vld [vmem:[%s3579_s4] sm:$0xff]  ;;  %vm1929_vm8 = vcmp.gt.s32.totalorder %v3104_v43, 5  ;;  %vm1935_vm9 = vcmp.gt.s32.totalorder %v3104_v43, 7 }
  0x38   :  { %2367 = vmatpush1.bf16.msra.mxu0 %v3089_v32  ;;  %v3156_v21 = vpack.c.bf16 %v106_v19, %v103_v18  ;;  %v109_v24 = vld [vmem:[#allocation6 + $0x160] sm:$0xff]  ;;  %v112_v25 = vld [vmem:[#allocation6 + $0x178] sm:$0xff]  ;;  %v63_v47 = vld [vmem:[#allocation3 + $0x8] sm:$0xff] }
  0x39   :  { %2369 = vmatprep.subr.bf16.mxu0 %v3092_v34  ;;  %2392 = vmatpush3.bf16.msra.mxu1 %v3110_v48  ;;  %v3164_v26 = vpack.c.bf16 %v112_v25, %v109_v24  ;;  %v59_v31 = vld [vmem:[%s3578_s3] sm:$0x7]  ;;  %v62_v37 = vld [vmem:[#allocation3] sm:$0xff]  ;;  %v64_v7 = vld [vmem:[#allocation3 + $0x10] sm:$0xff]  ;;  %s2998_s3 = smov [#allocation8]  }
  0x3a   :  { %2393 = vmatprep.subr.bf16.mxu1 %v2994_v0  ;;  %519 = vperm.xlu0 %2812, %v517_v54   ;;  %v3206_v35 = vrot.slane %v59_v31, %v116_v29  ;;  %v3208_v36 = vrot.slane %v59_v31, %v120_v33  ;;  %v3212_v60 = vrot.slane %v59_v31, %v124_v58  ;;  %v967_v31 = vsel %vm1923_vm7, 1, %v2997_v2  ;;  %s1885_s25 = sshll.u32 %s2998_s3, 4  ;;  %s1886_s25 = int_to_ptr.vmem [resolvable:$true] %s1885_s25 }
  0x3b   :  { %v1417_v33 = vsel %vm1929_vm8, 1, %v2997_v2  ;;  %s2938_s28 = scalar_lea.vmem %s1886_s25, 1024  ;;  %p2943_p3 = scmp.lt.s32.totalorder %s1886_s25, %s1886_s25 }
  0x3c   :  { %2371 = vmatpush1.bf16.msra.mxu0 %v3099_v42  ;;  %p2939_p2 = scmp.ne.s32.totalorder %s1886_s25, %s2938_s28  ;;  %p2944_p4 = scmp.lt.s32.totalorder %s2938_s28, %s2938_s28 }
  0x3d   :  { %2373 = vmatprep.subr.bf16.mxu0 %v3107_v44  ;;  %2395 = vmatpush3.bf16.msra.mxu1 %v3124_v59 }
  0x3e   :  { %2396 = vmatprep.subr.bf16.mxu1 %v2994_v0  ;;  %1194 = vperm.xlu0 %2812, %v1192_v3   ;;  %p2945_p5 = por %p2944_p4, %p2943_p3 }
  0x40   :  { %2375 = vmatpush1.bf16.msra.mxu0 %v3117_v53  ;;  %p2946_p6 = pnand %p2945_p5, %p2939_p2 }
  0x41   :  { %2377 = vmatprep.subr.bf16.mxu0 %v3121_v55  ;;  %2398 = vmatpush3.bf16.msra.mxu1 %v3136_v8 }
  0x42   :  { %2399 = vmatprep.subr.bf16.mxu1 %v2994_v0  ;;  %1644 = vperm.xlu0 %2812, %v1642_v14  }
  0x44   :  { %2379 = vmatpush1.bf16.msra.mxu0 %v3129_v63 }
  0x45   :  { %2381 = vmatprep.subr.bf16.mxu0 %v3133_v4  ;;  %2401 = vmatpush3.bf16.msra.mxu1 %v3146_v15 }
  0x46   :  { %2402 = vmatprep.subr.bf16.mxu1 %v2994_v0 }
  0x48   :  { %2383 = vmatpush1.bf16.msra.mxu0 %v3141_v13 }
  0x49   :  { %2409 = vmatprep.subr.bf16.mxu0 %v3067_v6  ;;  %2404 = vmatpush3.bf16.msra.mxu1 %v3156_v21 }
  0x4a   :  { %2405 = vmatprep.subr.bf16.mxu1 %v2994_v0 }
  0x4b   :  { %194 = vmatmul.mubr.f32.vlgmr.msra.gmra.mrb[0].mxu0 %v3153_v20 }
  0x4c   :  { %2411 = vmatpush1.bf16.msra.mxu0 %v3069_v10  ;;  %417 = vmatprep.mubr.f32.mxu0 %v2995_v1 }
  0x4d   :  { %2413 = vmatprep.subr.bf16.mxu0 %v3071_v11  ;;  %2407 = vmatpush3.bf16.msra.mxu1 %v3164_v26 }
  0x4e   :  { %2440 = vmatprep.subr.bf16.mxu1 %v2994_v0 }
  0x50   :  { %2415 = vmatpush1.bf16.msra.mxu0 %v3075_v16  ;;  %2105 = vmatmul.mubr.f32.vlgmr.msra.gmra.mrb[0].mxu1 %v3153_v20 }
  0x51   :  { %2417 = vmatprep.subr.bf16.mxu0 %v3078_v17  ;;  %2442 = vmatpush3.bf16.msra.mxu1 %v3086_v30 }
  0x52   :  { %2443 = vmatprep.subr.bf16.mxu1 %v2994_v0  ;;  %2139 = vmatprep.mubr.msk.f32.mxu1 %vm2996_vm0, %v2995_v1 }
  0x54   :  { %2419 = vmatpush1.bf16.msra.mxu0 %v3081_v22 }
  0x55   :  { %2421 = vmatprep.subr.bf16.mxu0 %v3084_v23  ;;  %2445 = vmatpush3.bf16.msra.mxu1 %v3095_v38 }
  0x56   :  { %2446 = vmatprep.subr.bf16.mxu1 %v2994_v0 }
  0x58   :  { %2423 = vmatpush1.bf16.msra.mxu0 %v3089_v32 }
  0x59   :  { %2425 = vmatprep.subr.bf16.mxu0 %v3092_v34  ;;  %2448 = vmatpush3.bf16.msra.mxu1 %v3110_v48 }
  0x5a   :  { %2449 = vmatprep.subr.bf16.mxu1 %v2994_v0 }
  0x5c   :  { %2427 = vmatpush1.bf16.msra.mxu0 %v3099_v42 }
  0x5d   :  { %2429 = vmatprep.subr.bf16.mxu0 %v3107_v44  ;;  %2451 = vmatpush3.bf16.msra.mxu1 %v3124_v59 }
  0x5e   :  { %2452 = vmatprep.subr.bf16.mxu1 %v2994_v0 }
  0x60   :  { %2431 = vmatpush1.bf16.msra.mxu0 %v3117_v53 }
  0x61   :  { %2433 = vmatprep.subr.bf16.mxu0 %v3121_v55  ;;  %2454 = vmatpush3.bf16.msra.mxu1 %v3136_v8 }
  0x62   :  { %2455 = vmatprep.subr.bf16.mxu1 %v2994_v0 }
  0x64   :  { %2435 = vmatpush1.bf16.msra.mxu0 %v3129_v63 }
  0x65   :  { %2437 = vmatprep.subr.bf16.mxu0 %v3133_v4  ;;  %2457 = vmatpush3.bf16.msra.mxu1 %v3146_v15 }
  0x66   :  { %2458 = vmatprep.subr.bf16.mxu1 %v2994_v0 }
  0x68   :  { %2439 = vmatpush1.bf16.msra.mxu0 %v3141_v13 }
  0x69   :  { %2465 = vmatprep.subr.bf16.mxu0 %v3067_v6  ;;  %2460 = vmatpush3.bf16.msra.mxu1 %v3156_v21 }
  0x6a   :  { %2461 = vmatprep.subr.bf16.mxu1 %v2994_v0 }
  0x6d   :  { %2463 = vmatpush3.bf16.msra.mxu1 %v3164_v26 }
  0x6e   :  { %2496 = vmatprep.subr.bf16.mxu1 %v2994_v0 }
  0xb5   :  { %v296_v24 = vpop.permute.xlu0 %295 }
  0xb6   :  { %vm297_vm5 = vcmp.eq.s32.totalorder %v296_v24, 1 }
 0x11e   :  { %v195_v39 = vpop.f32.mrb[0].mxu0 }
 0x11f   :  { %v196_v40 = vadd.f32 %v195_v39, %v3206_v35  ;;  %v197_v41 = vpop.f32.mrb[1].mxu0 }
 0x120   :  { %v198_v45 = vadd.f32 %v197_v41, %v3208_v36 }
 0x121   :  { %v270_v46 = vadd.f32 %v196_v40, %v62_v37  ;;  %v302_v37 = vld [vmem:[#allocation3 + $0x18] sm:$0xff] }
 0x122   :  { %v277_v50 = vadd.f32 %v198_v45, %v63_v47 }
 0x123   :  { %v1912_v49 = vmul.f32 -1.442695, %v270_v46  ;;  %v266_v51 = vpop.f32.mrb[0].mxu1 }
 0x124   :  { %v1913_v52 = vmul.f32 -1.442695, %v277_v50  ;;  %v2106_v54 = vpop.f32.mrb[1].mxu1  ;;  %v267_v3 = vadd.f32 %v266_v51, %v3212_v60  ;;  %v303_v50 = vld [vmem:[#allocation3 + $0x20] sm:$0xff] }
 0x125   :  { %2814 = vpow2.f32 %v1912_v49 }
 0x126   :  { %2816 = vpow2.f32 %v1913_v52 }
 0x12f   :  { %v2815_v56 = vpop.eup %2814 }
 0x130   :  { %v274_v57 = vadd.f32 1.0, %v2815_v56  ;;  %v2817_v61 = vpop.eup %2816 }
 0x131   :  { %v281_v62 = vadd.f32 1.0, %v2817_v61 }
 0x132   :  { %2818 = vrcp.f32 %v274_v57 }
 0x133   :  { %2820 = vrcp.f32 %v281_v62  ;;  %v304_v62 = vld [vmem:[#allocation3 + $0x28] sm:$0xff] }
 0x13c   :  { %v2819_v5 = vpop.eup %2818 }
 0x13d   :  { %v284_v9 = vmul.f32 %v2819_v5, %v267_v3  ;;  %v2821_v14 = vpop.eup %2820 }
 0x13e   :  { %v287_v18 = vsub.f32 1.0, %v2821_v14  ;;  %v289_v27 = vmul.f32 %v2821_v14, %v3153_v20 }
 0x13f   :  { %v285_v12 = vadd.f32 %v284_v9, %v64_v7 }
 0x141   :  { %2822 = vtanh.f32 %v285_v12 }
 0x14b   :  { %v2823_v19 = vpop.eup %2822 }
 0x14c   :  { %v288_v25 = vmul.f32 %v2823_v19, %v287_v18  ;;  %v520_v19 = vpop.permute.xlu0 %519 }
 0x14d   :  { %vm521_vm10 = vcmp.eq.s32.totalorder %v520_v19, 1  ;;  %v999_v19 = vld [vmem:[#allocation6 + $0x98] sm:$0xff] }
 0x14e   :  { %v290_v28 = vadd.f32 %v289_v27, %v288_v25 }
 0x150   :  { %v3217_v29 = vsel %vm297_vm5, %v290_v28, %v3153_v20  ;;  %v742_v20 = vsel %vm1920_vm6, 1, %v2997_v2 }
 0x151   :  { %299 = vst [vmem:[#allocation8] sm:$0xff] %v3217_v29  ;;  %418 = vmatmul.mubr.f32.vlgmr.msra.gmra.mrb[2].mxu0 %v3217_v29  ;;  %2140 = vmatmul.mubr.f32.vlgmr.msra.gmra.mrb[2].mxu1 %v3217_v29 }
 0x152   :  { %2467 = vmatpush1.bf16.msra.mxu0 %v3069_v10  ;;  %2498 = vmatpush3.bf16.msra.mxu1 %v3086_v30 }
 0x153   :  { %2469 = vmatprep.subr.bf16.mxu0 %v3071_v11  ;;  %2499 = vmatprep.subr.bf16.mxu1 %v2994_v0 }
 0x154   :  { %642 = vmatprep.mubr.f32.mxu0 %v2995_v1  ;;  %2174 = vmatprep.mubr.msk.f32.mxu1 %vm2996_vm0, %v2995_v1 }
 0x155   :  { %744 = vperm.xlu1 %2813, %v742_v20  }
 0x156   :  { %2471 = vmatpush1.bf16.msra.mxu0 %v3075_v16  ;;  %2501 = vmatpush3.bf16.msra.mxu1 %v3095_v38 }
 0x157   :  { %2473 = vmatprep.subr.bf16.mxu0 %v3078_v17  ;;  %2502 = vmatprep.subr.bf16.mxu1 %v2994_v0 }
 0x159   :  { %969 = vperm.xlu1 %2813, %v967_v31  }
 0x15a   :  { %2475 = vmatpush1.bf16.msra.mxu0 %v3081_v22  ;;  %2504 = vmatpush3.bf16.msra.mxu1 %v3110_v48 }
 0x15b   :  { %2477 = vmatprep.subr.bf16.mxu0 %v3084_v23  ;;  %2505 = vmatprep.subr.bf16.mxu1 %v2994_v0 }
 0x15d   :  { %1419 = vperm.xlu1 %2813, %v1417_v33  }
 0x15e   :  { %2479 = vmatpush1.bf16.msra.mxu0 %v3089_v32  ;;  %2507 = vmatpush3.bf16.msra.mxu1 %v3124_v59 }
 0x15f   :  { %2481 = vmatprep.subr.bf16.mxu0 %v3092_v34  ;;  %2508 = vmatprep.subr.bf16.mxu1 %v2994_v0 }
 0x162   :  { %2483 = vmatpush1.bf16.msra.mxu0 %v3099_v42  ;;  %2510 = vmatpush3.bf16.msra.mxu1 %v3136_v8 }
 0x163   :  { %2485 = vmatprep.subr.bf16.mxu0 %v3107_v44  ;;  %2511 = vmatprep.subr.bf16.mxu1 %v2994_v0 }
 0x166   :  { %2487 = vmatpush1.bf16.msra.mxu0 %v3117_v53  ;;  %2513 = vmatpush3.bf16.msra.mxu1 %v3146_v15 }
 0x167   :  { %2489 = vmatprep.subr.bf16.mxu0 %v3121_v55  ;;  %2514 = vmatprep.subr.bf16.mxu1 %v2994_v0 }
 0x16a   :  { %2491 = vmatpush1.bf16.msra.mxu0 %v3129_v63  ;;  %2516 = vmatpush3.bf16.msra.mxu1 %v3156_v21 }
 0x16b   :  { %2493 = vmatprep.subr.bf16.mxu0 %v3133_v4  ;;  %2517 = vmatprep.subr.bf16.mxu1 %v2994_v0 }
 0x16e   :  { %2495 = vmatpush1.bf16.msra.mxu0 %v3141_v13  ;;  %2519 = vmatpush3.bf16.msra.mxu1 %v3164_v26 }
 0x16f   :  { %2521 = vmatprep.subr.bf16.mxu0 %v3067_v6  ;;  %2552 = vmatprep.subr.bf16.mxu1 %v2994_v0  ;;  %v1867_v6 = vsel %vm1935_vm9, 1, %v2997_v2 }
 0x170   :  { %1869 = vperm.xlu1 %2813, %v1867_v6   ;;  %v981_v6 = vld [vmem:[#allocation6 + $0x8] sm:$0xff] }
 0x1d4   :  { %v745_v28 = vpop.permute.xlu1 %744 }
 0x1d5   :  { %vm746_vm11 = vcmp.eq.s32.totalorder %v745_v28, 1  ;;  %v1017_v28 = vld [vmem:[#allocation6 + $0x128] sm:$0xff] }
 0x224   :  { %v419_v39 = vpop.f32.mrb[2].mxu0  ;;  %v490_v40 = vpop.f32.mrb[2].mxu1 }
 0x225   :  { %v420_v41 = vadd.f32 %v419_v39, %v3206_v35  ;;  %v421_v45 = vpop.f32.mrb[3].mxu0  ;;  %v2141_v46 = vpop.f32.mrb[3].mxu1  ;;  %v491_v58 = vadd.f32 %v490_v40, %v3212_v60  ;;  %v980_v40 = vld [vmem:[#allocation6] sm:$0xff] }
 0x226   :  { %v422_v47 = vadd.f32 %v421_v45, %v3208_v36  ;;  %v982_v45 = vld [vmem:[#allocation6 + $0x10] sm:$0xff] }
 0x227   :  { %v494_v49 = vadd.f32 %v420_v41, %v302_v37  ;;  %v984_v37 = vld [vmem:[#allocation6 + $0x20] sm:$0xff]  ;;  %v983_v41 = vld [vmem:[#allocation6 + $0x18] sm:$0xff] }
 0x228   :  { %v501_v52 = vadd.f32 %v422_v47, %v303_v50  ;;  %v3322_v39 = vpack.c.bf16 %v984_v37, %v981_v6  ;;  %v3324_v46 = vpack.c.bf16 %v983_v41, %v980_v40  ;;  %v985_v47 = vld [vmem:[#allocation6 + $0x28] sm:$0xff]  ;;  %v987_v50 = vld [vmem:[#allocation6 + $0x38] sm:$0xff]  ;;  %v1018_v37 = vld [vmem:[#allocation6 + $0x130] sm:$0xff] }
 0x229   :  { %v1915_v51 = vmul.f32 -1.442695, %v494_v49  ;;  %v3327_v49 = vpack.c.bf16 %v985_v47, %v982_v45  ;;  %v1019_v6 = vld [vmem:[#allocation6 + $0x138] sm:$0xff]  ;;  %v1021_v40 = vld [vmem:[#allocation6 + $0x148] sm:$0xff]  ;;  %v1026_v45 = vld [vmem:[#allocation6 + $0x170] sm:$0xff] }
 0x22a   :  { %v1916_v54 = vmul.f32 -1.442695, %v501_v52  ;;  %v1023_v41 = vld [vmem:[#allocation6 + $0x158] sm:$0xff] }
 0x22b   :  { %2824 = vpow2.f32 %v1915_v51  ;;  %v990_v51 = vld [vmem:[#allocation6 + $0x50] sm:$0xff] }
 0x22c   :  { %2826 = vpow2.f32 %v1916_v54  ;;  %v3331_v52 = vpack.c.bf16 %v990_v51, %v987_v50  ;;  %v986_v54 = vld [vmem:[#allocation6 + $0x30] sm:$0xff]  ;;  %v3386_v50 = vpack.c.bf16 %v1021_v40, %v1018_v37  ;;  %v3388_v51 = vpack.c.bf16 %v1026_v45, %v1023_v41  ;;  %v970_v37 = vpop.permute.xlu1 %969 }
 0x22d   :  { %vm971_vm12 = vcmp.eq.s32.totalorder %v970_v37, 1 }
 0x235   :  { %v2825_v43 = vpop.eup %2824 }
 0x236   :  { %v498_v56 = vadd.f32 1.0, %v2825_v43  ;;  %v2827_v2 = vpop.eup %2826  ;;  %v989_v43 = vld [vmem:[#allocation6 + $0x48] sm:$0xff] }
 0x237   :  { %v505_v57 = vadd.f32 1.0, %v2827_v2  ;;  %v3334_v2 = vpack.c.bf16 %v989_v43, %v986_v54  ;;  %v1022_v54 = vld [vmem:[#allocation6 + $0x150] sm:$0xff]  ;;  %v1025_v43 = vld [vmem:[#allocation6 + $0x168] sm:$0xff] }
 0x238   :  { %2828 = vrcp.f32 %v498_v56  ;;  %v988_v56 = vld [vmem:[#allocation6 + $0x40] sm:$0xff] }
 0x239   :  { %2830 = vrcp.f32 %v505_v57  ;;  %v991_v57 = vld [vmem:[#allocation6 + $0x58] sm:$0xff] }
 0x242   :  { %v2829_v61 = vpop.eup %2828 }
 0x243   :  { %v508_v3 = vmul.f32 %v2829_v61, %v491_v58  ;;  %v2831_v7 = vpop.eup %2830  ;;  %v3337_v58 = vpack.c.bf16 %v991_v57, %v988_v56  ;;  %v993_v61 = vld [vmem:[#allocation6 + $0x68] sm:$0xff]  ;;  %v1024_v56 = vld [vmem:[#allocation6 + $0x160] sm:$0xff]  ;;  %v1027_v57 = vld [vmem:[#allocation6 + $0x178] sm:$0xff] }
 0x244   :  { %v511_v9 = vsub.f32 1.0, %v2831_v7  ;;  %v513_v18 = vmul.f32 %v2831_v7, %v3217_v29  ;;  %v995_v7 = vld [vmem:[#allocation6 + $0x78] sm:$0xff] }
 0x245   :  { %v509_v5 = vadd.f32 %v508_v3, %v304_v62  ;;  %v996_v62 = vld [vmem:[#allocation6 + $0x80] sm:$0xff] }
 0x246   :  { %v3341_v3 = vpack.c.bf16 %v996_v62, %v993_v61  ;;  %v3392_v61 = vpack.c.bf16 %v1025_v43, %v1022_v54  ;;  %v3396_v62 = vpack.c.bf16 %v1027_v57, %v1024_v56 }
 0x247   :  { %2832 = vtanh.f32 %v509_v5  ;;  %v992_v5 = vld [vmem:[#allocation6 + $0x60] sm:$0xff] }
 0x251   :  { %v2833_v12 = vpop.eup %2832 }
 0x252   :  { %v512_v14 = vmul.f32 %v2833_v12, %v511_v9  ;;  %v994_v9 = vld [vmem:[#allocation6 + $0x70] sm:$0xff]  ;;  %v3344_v12 = vpack.c.bf16 %v995_v7, %v992_v5  ;;  %v752_v5 = vld [vmem:[#allocation3 + $0x48] sm:$0xff] }
 0x254   :  { %v514_v24 = vadd.f32 %v513_v18, %v512_v14  ;;  %v997_v14 = vld [vmem:[#allocation6 + $0x88] sm:$0xff] }
 0x255   :  { %v3347_v18 = vpack.c.bf16 %v997_v14, %v994_v9 }
 0x256   :  { %v3270_v25 = vsel %vm521_vm10, %v514_v24, %v3217_v29  ;;  %v1002_v24 = vld [vmem:[#allocation6 + $0xb0] sm:$0xff] }
 0x257   :  { %524 = vst [vmem:[#allocation8 + $0x8] sm:$0xff] %v3270_v25  ;;  %643 = vmatmul.mubr.f32.vlgmr.msra.gmra.mrb[4].mxu0 %v3270_v25  ;;  %2175 = vmatmul.mubr.f32.vlgmr.msra.gmra.mrb[4].mxu1 %v3270_v25 }
 0x258   :  { %2523 = vmatpush1.bf16.msra.mxu0 %v3069_v10  ;;  %2554 = vmatpush3.bf16.msra.mxu1 %v3086_v30  ;;  %v527_v10 = vld [vmem:[#allocation3 + $0x30] sm:$0xff] }
 0x259   :  { %2525 = vmatprep.subr.bf16.mxu0 %v3071_v11  ;;  %2555 = vmatprep.subr.bf16.mxu1 %v2994_v0 }
 0x25a   :  { %867 = vmatprep.mubr.f32.mxu0 %v2995_v1  ;;  %2209 = vmatprep.mubr.msk.f32.mxu1 %vm2996_vm0, %v2995_v1 }
 0x25c   :  { %2527 = vmatpush1.bf16.msra.mxu0 %v3075_v16  ;;  %2557 = vmatpush3.bf16.msra.mxu1 %v3095_v38 }
 0x25d   :  { %2529 = vmatprep.subr.bf16.mxu0 %v3078_v17  ;;  %2558 = vmatprep.subr.bf16.mxu1 %v2994_v0 }
 0x260   :  { %2531 = vmatpush1.bf16.msra.mxu0 %v3081_v22  ;;  %2560 = vmatpush3.bf16.msra.mxu1 %v3110_v48 }
 0x261   :  { %2533 = vmatprep.subr.bf16.mxu0 %v3084_v23  ;;  %2561 = vmatprep.subr.bf16.mxu1 %v2994_v0 }
 0x264   :  { %2535 = vmatpush1.bf16.msra.mxu0 %v3089_v32  ;;  %2563 = vmatpush3.bf16.msra.mxu1 %v3124_v59 }
 0x265   :  { %2537 = vmatprep.subr.bf16.mxu0 %v3092_v34  ;;  %2564 = vmatprep.subr.bf16.mxu1 %v2994_v0  ;;  %v528_v34 = vld [vmem:[#allocation3 + $0x38] sm:$0xff] }
 0x268   :  { %2539 = vmatpush1.bf16.msra.mxu0 %v3099_v42  ;;  %2566 = vmatpush3.bf16.msra.mxu1 %v3136_v8  ;;  %v529_v8 = vld [vmem:[#allocation3 + $0x40] sm:$0xff] }
 0x269   :  { %2541 = vmatprep.subr.bf16.mxu0 %v3107_v44  ;;  %2567 = vmatprep.subr.bf16.mxu1 %v2994_v0 }
 0x26c   :  { %2543 = vmatpush1.bf16.msra.mxu0 %v3117_v53  ;;  %2569 = vmatpush3.bf16.msra.mxu1 %v3146_v15 }
 0x26d   :  { %2545 = vmatprep.subr.bf16.mxu0 %v3121_v55  ;;  %2570 = vmatprep.subr.bf16.mxu1 %v2994_v0 }
 0x270   :  { %2547 = vmatpush1.bf16.msra.mxu0 %v3129_v63  ;;  %2572 = vmatpush3.bf16.msra.mxu1 %v3156_v21 }
 0x271   :  { %2549 = vmatprep.subr.bf16.mxu0 %v3133_v4  ;;  %2573 = vmatprep.subr.bf16.mxu1 %v2994_v0 }
 0x274   :  { %2551 = vmatpush1.bf16.msra.mxu0 %v3141_v13  ;;  %2575 = vmatpush3.bf16.msra.mxu1 %v3164_v26 }
 0x275   :  { %2608 = vmatprep.subr.bf16.mxu1 %v2994_v0  ;;  %2577 = vmatprep.subr.bf16.mxu0 %v3322_v39 }
 0x32a   :  { %v644_v11 = vpop.f32.mrb[4].mxu0  ;;  %v715_v16 = vpop.f32.mrb[4].mxu1 }
 0x32b   :  { %v645_v17 = vadd.f32 %v644_v11, %v3206_v35  ;;  %v646_v22 = vpop.f32.mrb[5].mxu0  ;;  %v2176_v23 = vpop.f32.mrb[5].mxu1  ;;  %v716_v63 = vadd.f32 %v715_v16, %v3212_v60  ;;  %v1001_v11 = vld [vmem:[#allocation6 + $0xa8] sm:$0xff]  ;;  %v1000_v16 = vld [vmem:[#allocation6 + $0xa0] sm:$0xff] }
 0x32c   :  { %v647_v30 = vadd.f32 %v646_v22, %v3208_v36  ;;  %v1003_v22 = vld [vmem:[#allocation6 + $0xb8] sm:$0xff] }
 0x32d   :  { %v719_v32 = vadd.f32 %v645_v17, %v527_v10  ;;  %v998_v10 = vld [vmem:[#allocation6 + $0x90] sm:$0xff]  ;;  %v3357_v23 = vpack.c.bf16 %v1003_v22, %v1000_v16 }
 0x32e   :  { %v726_v42 = vadd.f32 %v647_v30, %v528_v34  ;;  %v3354_v17 = vpack.c.bf16 %v1001_v11, %v998_v10  ;;  %v1005_v30 = vld [vmem:[#allocation6 + $0xc8] sm:$0xff]  ;;  %v753_v16 = vld [vmem:[#allocation3 + $0x50] sm:$0xff] }
 0x32f   :  { %v1918_v38 = vmul.f32 -1.442695, %v719_v32  ;;  %v1008_v32 = vld [vmem:[#allocation6 + $0xe0] sm:$0xff] }
 0x330   :  { %v1919_v44 = vmul.f32 -1.442695, %v726_v42  ;;  %v3361_v34 = vpack.c.bf16 %v1008_v32, %v1005_v30  ;;  %v1007_v42 = vld [vmem:[#allocation6 + $0xd8] sm:$0xff] }
 0x331   :  { %2834 = vpow2.f32 %v1918_v38  ;;  %v1004_v38 = vld [vmem:[#allocation6 + $0xc0] sm:$0xff] }
 0x332   :  { %2836 = vpow2.f32 %v1919_v44  ;;  %v1006_v44 = vld [vmem:[#allocation6 + $0xd0] sm:$0xff] }
 0x33b   :  { %v2835_v48 = vpop.eup %2834 }
 0x33c   :  { %v723_v53 = vadd.f32 1.0, %v2835_v48  ;;  %v2837_v55 = vpop.eup %2836  ;;  %v3364_v48 = vpack.c.bf16 %v1007_v42, %v1004_v38 }
 0x33d   :  { %v730_v59 = vadd.f32 1.0, %v2837_v55 }
 0x33e   :  { %2838 = vrcp.f32 %v723_v53  ;;  %v1009_v53 = vld [vmem:[#allocation6 + $0xe8] sm:$0xff] }
 0x33f   :  { %2840 = vrcp.f32 %v730_v59  ;;  %v3367_v55 = vpack.c.bf16 %v1009_v53, %v1006_v44  ;;  %v1011_v59 = vld [vmem:[#allocation6 + $0xf8] sm:$0xff] }
 0x348   :  { %v2839_v4 = vpop.eup %2838 }
 0x349   :  { %v733_v13 = vmul.f32 %v2839_v4, %v716_v63  ;;  %v2841_v21 = vpop.eup %2840  ;;  %v1014_v63 = vld [vmem:[#allocation6 + $0x110] sm:$0xff] }
 0x34a   :  { %v736_v26 = vsub.f32 1.0, %v2841_v21  ;;  %v738_v20 = vmul.f32 %v2841_v21, %v3270_v25  ;;  %v1010_v4 = vld [vmem:[#allocation6 + $0xf0] sm:$0xff]  ;;  %v1015_v21 = vld [vmem:[#allocation6 + $0x118] sm:$0xff] }
 0x34b   :  { %v734_v15 = vadd.f32 %v733_v13, %v529_v8  ;;  %v3370_v8 = vpack.c.bf16 %v1014_v63, %v1011_v59  ;;  %v1013_v13 = vld [vmem:[#allocation6 + $0x108] sm:$0xff] }
 0x34d   :  { %2842 = vtanh.f32 %v734_v15  ;;  %v1012_v15 = vld [vmem:[#allocation6 + $0x100] sm:$0xff] }
 0x357   :  { %v2843_v27 = vpop.eup %2842 }
 0x358   :  { %v737_v29 = vmul.f32 %v2843_v27, %v736_v26  ;;  %v3373_v26 = vpack.c.bf16 %v1013_v13, %v1010_v4  ;;  %v3375_v27 = vpack.c.bf16 %v1015_v21, %v1012_v15  ;;  %v754_v4 = vld [vmem:[#allocation3 + $0x58] sm:$0xff] }
 0x35a   :  { %v739_v31 = vadd.f32 %v738_v20, %v737_v29  ;;  %v1020_v29 = vld [vmem:[#allocation6 + $0x140] sm:$0xff] }
 0x35b   :  { %v1016_v20 = vld [vmem:[#allocation6 + $0x120] sm:$0xff] }
 0x35c   :  { %v3314_v33 = vsel %vm746_vm11, %v739_v31, %v3270_v25  ;;  %v3351_v25 = vpack.c.bf16 %v1002_v24, %v999_v19  ;;  %v3379_v31 = vpack.c.bf16 %v1020_v29, %v1017_v28  ;;  %v3382_v47 = vpack.c.bf16 %v1019_v6, %v1016_v20 }
 0x35d   :  { %749 = vst [vmem:[#allocation8 + $0x10] sm:$0xff] %v3314_v33  ;;  %868 = vmatmul.mubr.f32.vlgmr.msra.gmra.mrb[6].mxu0 %v3314_v33  ;;  %2210 = vmatmul.mubr.f32.vlgmr.msra.gmra.mrb[6].mxu1 %v3314_v33 }
 0x35e   :  { %1092 = vmatprep.mubr.f32.mxu0 %v2995_v1  ;;  %2244 = vmatprep.mubr.msk.f32.mxu1 %vm2996_vm0, %v2995_v1 }
 0x35f   :  { %2579 = vmatpush1.bf16.msra.mxu0 %v3324_v46  ;;  %2610 = vmatpush3.bf16.msra.mxu1 %v3327_v49 }
 0x360   :  { %2611 = vmatprep.subr.bf16.mxu1 %v2994_v0  ;;  %2581 = vmatprep.subr.bf16.mxu0 %v3331_v52 }
 0x363   :  { %2583 = vmatpush1.bf16.msra.mxu0 %v3334_v2  ;;  %2613 = vmatpush3.bf16.msra.mxu1 %v3337_v58 }
 0x364   :  { %2614 = vmatprep.subr.bf16.mxu1 %v2994_v0  ;;  %2585 = vmatprep.subr.bf16.mxu0 %v3341_v3 }
 0x367   :  { %2587 = vmatpush1.bf16.msra.mxu0 %v3344_v12  ;;  %2616 = vmatpush3.bf16.msra.mxu1 %v3347_v18 }
 0x368   :  { %2617 = vmatprep.subr.bf16.mxu1 %v2994_v0  ;;  %2589 = vmatprep.subr.bf16.mxu0 %v3351_v25 }
 0x36b   :  { %2591 = vmatpush1.bf16.msra.mxu0 %v3354_v17  ;;  %2619 = vmatpush3.bf16.msra.mxu1 %v3357_v23 }
 0x36c   :  { %2620 = vmatprep.subr.bf16.mxu1 %v2994_v0  ;;  %2593 = vmatprep.subr.bf16.mxu0 %v3361_v34 }
 0x36f   :  { %2595 = vmatpush1.bf16.msra.mxu0 %v3364_v48  ;;  %2622 = vmatpush3.bf16.msra.mxu1 %v3367_v55 }
 0x370   :  { %2597 = vmatprep.subr.bf16.mxu0 %v3370_v8  ;;  %2623 = vmatprep.subr.bf16.mxu1 %v2994_v0 }
 0x373   :  { %2599 = vmatpush1.bf16.msra.mxu0 %v3373_v26  ;;  %2625 = vmatpush3.bf16.msra.mxu1 %v3375_v27 }
 0x374   :  { %2601 = vmatprep.subr.bf16.mxu0 %v3379_v31  ;;  %2626 = vmatprep.subr.bf16.mxu1 %v2994_v0 }
 0x377   :  { %2603 = vmatpush1.bf16.msra.mxu0 %v3382_v47  ;;  %2628 = vmatpush3.bf16.msra.mxu1 %v3386_v50 }
 0x378   :  { %2605 = vmatprep.subr.bf16.mxu0 %v3388_v51  ;;  %2629 = vmatprep.subr.bf16.mxu1 %v2994_v0 }
 0x37b   :  { %2607 = vmatpush1.bf16.msra.mxu0 %v3392_v61  ;;  %2631 = vmatpush3.bf16.msra.mxu1 %v3396_v62 }
 0x37c   :  { %2633 = vmatprep.subr.bf16.mxu0 %v3322_v39  ;;  %2664 = vmatprep.subr.bf16.mxu1 %v2994_v0 }
 0x430   :  { %v869_v7 = vpop.f32.mrb[6].mxu0  ;;  %v940_v9 = vpop.f32.mrb[6].mxu1 }
 0x431   :  { %v870_v14 = vadd.f32 %v869_v7, %v3206_v35  ;;  %v871_v19 = vpop.f32.mrb[7].mxu0  ;;  %v2211_v24 = vpop.f32.mrb[7].mxu1  ;;  %v941_v59 = vadd.f32 %v940_v9, %v3212_v60  ;;  %v978_v9 = vld [vmem:[#allocation3 + $0x68] sm:$0xff] }
 0x432   :  { %v872_v10 = vadd.f32 %v871_v19, %v3208_v36 }
 0x433   :  { %v944_v11 = vadd.f32 %v870_v14, %v752_v5 }
 0x434   :  { %v951_v30 = vadd.f32 %v872_v10, %v753_v16 }
 0x435   :  { %v1921_v22 = vmul.f32 -1.442695, %v944_v11 }
 0x436   :  { %v1922_v32 = vmul.f32 -1.442695, %v951_v30 }
 0x437   :  { %2844 = vpow2.f32 %v1921_v22 }
 0x438   :  { %2846 = vpow2.f32 %v1922_v32 }
 0x441   :  { %v2845_v38 = vpop.eup %2844 }
 0x442   :  { %v948_v42 = vadd.f32 1.0, %v2845_v38  ;;  %v2847_v44 = vpop.eup %2846  ;;  %v979_v38 = vld [vmem:[#allocation3 + $0x70] sm:$0xff] }
 0x443   :  { %v955_v53 = vadd.f32 1.0, %v2847_v44 }
 0x444   :  { %2848 = vrcp.f32 %v948_v42 }
 0x445   :  { %2850 = vrcp.f32 %v955_v53 }
 0x44e   :  { %v2849_v63 = vpop.eup %2848 }
 0x44f   :  { %v958_v13 = vmul.f32 %v2849_v63, %v941_v59  ;;  %v2851_v21 = vpop.eup %2850 }
 0x450   :  { %v961_v28 = vsub.f32 1.0, %v2851_v21  ;;  %v963_v6 = vmul.f32 %v2851_v21, %v3314_v33 }
 0x451   :  { %v959_v15 = vadd.f32 %v958_v13, %v754_v4 }
 0x453   :  { %2852 = vtanh.f32 %v959_v15  ;;  %v1195_v15 = vpop.permute.xlu0 %1194 }
 0x454   :  { %vm1196_vm13 = vcmp.eq.s32.totalorder %v1195_v15, 1  ;;  %v1652_v15 = vld [vmem:[#allocation3 + $0xa8] sm:$0xff] }
 0x45d   :  { %v2853_v29 = vpop.eup %2852 }
 0x45e   :  { %v962_v20 = vmul.f32 %v2853_v29, %v961_v28  ;;  %v1202_v29 = vld [vmem:[#allocation3 + $0x78] sm:$0xff] }
 0x460   :  { %v964_v40 = vadd.f32 %v963_v6, %v962_v20 }
 0x462   :  { %v3408_v41 = vsel %vm971_vm12, %v964_v40, %v3314_v33  ;;  %v977_v33 = vld [vmem:[#allocation3 + $0x60] sm:$0xff] }
 0x463   :  { %974 = vst [vmem:[#allocation8 + $0x18] sm:$0xff] %v3408_v41  ;;  %1093 = vmatmul.mubr.f32.vlgmr.msra.gmra.mrb[8].mxu0 %v3408_v41  ;;  %2245 = vmatmul.mubr.f32.vlgmr.msra.gmra.mrb[8].mxu1 %v3408_v41 }
 0x464   :  { %2635 = vmatpush1.bf16.msra.mxu0 %v3324_v46  ;;  %2666 = vmatpush3.bf16.msra.mxu1 %v3327_v49 }
 0x465   :  { %2637 = vmatprep.subr.bf16.mxu0 %v3331_v52  ;;  %2667 = vmatprep.subr.bf16.mxu1 %v2994_v0 }
 0x466   :  { %1317 = vmatprep.mubr.f32.mxu0 %v2995_v1  ;;  %2279 = vmatprep.mubr.msk.f32.mxu1 %vm2996_vm0, %v2995_v1 }
 0x468   :  { %2639 = vmatpush1.bf16.msra.mxu0 %v3334_v2  ;;  %2669 = vmatpush3.bf16.msra.mxu1 %v3337_v58 }
 0x469   :  { %2641 = vmatprep.subr.bf16.mxu0 %v3341_v3  ;;  %2670 = vmatprep.subr.bf16.mxu1 %v2994_v0 }
 0x46c   :  { %2643 = vmatpush1.bf16.msra.mxu0 %v3344_v12  ;;  %2672 = vmatpush3.bf16.msra.mxu1 %v3347_v18 }
 0x46d   :  { %2645 = vmatprep.subr.bf16.mxu0 %v3351_v25  ;;  %2673 = vmatprep.subr.bf16.mxu1 %v2994_v0 }
 0x470   :  { %2647 = vmatpush1.bf16.msra.mxu0 %v3354_v17  ;;  %2675 = vmatpush3.bf16.msra.mxu1 %v3357_v23 }
 0x471   :  { %2649 = vmatprep.subr.bf16.mxu0 %v3361_v34  ;;  %2676 = vmatprep.subr.bf16.mxu1 %v2994_v0 }
 0x474   :  { %2651 = vmatpush1.bf16.msra.mxu0 %v3364_v48  ;;  %2678 = vmatpush3.bf16.msra.mxu1 %v3367_v55 }
 0x475   :  { %2653 = vmatprep.subr.bf16.mxu0 %v3370_v8  ;;  %2679 = vmatprep.subr.bf16.mxu1 %v2994_v0 }
 0x478   :  { %2655 = vmatpush1.bf16.msra.mxu0 %v3373_v26  ;;  %2681 = vmatpush3.bf16.msra.mxu1 %v3375_v27 }
 0x479   :  { %2657 = vmatprep.subr.bf16.mxu0 %v3379_v31  ;;  %2682 = vmatprep.subr.bf16.mxu1 %v2994_v0 }
 0x47c   :  { %2659 = vmatpush1.bf16.msra.mxu0 %v3382_v47  ;;  %2684 = vmatpush3.bf16.msra.mxu1 %v3386_v50 }
 0x47d   :  { %2661 = vmatprep.subr.bf16.mxu0 %v3388_v51  ;;  %2685 = vmatprep.subr.bf16.mxu1 %v2994_v0 }
 0x480   :  { %2663 = vmatpush1.bf16.msra.mxu0 %v3392_v61  ;;  %2687 = vmatpush3.bf16.msra.mxu1 %v3396_v62 }
 0x481   :  { %2689 = vmatprep.subr.bf16.mxu0 %v3322_v39  ;;  %2720 = vmatprep.subr.bf16.mxu1 %v2994_v0 }
 0x536   :  { %v1094_v45 = vpop.f32.mrb[8].mxu0  ;;  %v1165_v54 = vpop.f32.mrb[8].mxu1 }
 0x537   :  { %v1095_v43 = vadd.f32 %v1094_v45, %v3206_v35  ;;  %v1096_v56 = vpop.f32.mrb[9].mxu0  ;;  %v2246_v57 = vpop.f32.mrb[9].mxu1  ;;  %v1166_v30 = vadd.f32 %v1165_v54, %v3212_v60  ;;  %v1203_v54 = vld [vmem:[#allocation3 + $0x80] sm:$0xff] }
 0x538   :  { %v1097_v5 = vadd.f32 %v1096_v56, %v3208_v36 }
 0x539   :  { %v1169_v7 = vadd.f32 %v1095_v43, %v977_v33 }
 0x53a   :  { %v1176_v19 = vadd.f32 %v1097_v5, %v978_v9 }
 0x53b   :  { %v1924_v14 = vmul.f32 -1.442695, %v1169_v7 }
 0x53c   :  { %v1925_v24 = vmul.f32 -1.442695, %v1176_v19 }
 0x53d   :  { %2854 = vpow2.f32 %v1924_v14 }
 0x53e   :  { %2856 = vpow2.f32 %v1925_v24  ;;  %v1204_v24 = vld [vmem:[#allocation3 + $0x88] sm:$0xff] }
 0x547   :  { %v2855_v10 = vpop.eup %2854 }
 0x548   :  { %v1173_v11 = vadd.f32 1.0, %v2855_v10  ;;  %v2857_v16 = vpop.eup %2856 }
 0x549   :  { %v1180_v22 = vadd.f32 1.0, %v2857_v16 }
 0x54a   :  { %2858 = vrcp.f32 %v1173_v11 }
 0x54b   :  { %2860 = vrcp.f32 %v1180_v22 }
 0x554   :  { %v2859_v32 = vpop.eup %2858 }
 0x555   :  { %v1183_v42 = vmul.f32 %v2859_v32, %v1166_v30  ;;  %v2861_v53 = vpop.eup %2860 }
 0x556   :  { %v1186_v59 = vsub.f32 1.0, %v2861_v53  ;;  %v1188_v13 = vmul.f32 %v2861_v53, %v3408_v41 }
 0x557   :  { %v1184_v44 = vadd.f32 %v1183_v42, %v979_v38  ;;  %v1420_v42 = vpop.permute.xlu1 %1419 }
 0x558   :  { %vm1421_vm14 = vcmp.eq.s32.totalorder %v1420_v42, 1 }
 0x559   :  { %2862 = vtanh.f32 %v1184_v44 }
 0x563   :  { %v2863_v63 = vpop.eup %2862 }
 0x564   :  { %v1187_v4 = vmul.f32 %v2863_v63, %v1186_v59 }
 0x566   :  { %v1189_v21 = vadd.f32 %v1188_v13, %v1187_v4 }
 0x568   :  { %v3453_v28 = vsel %vm1196_vm13, %v1189_v21, %v3408_v41 }
 0x569   :  { %1199 = vst [vmem:[#allocation8 + $0x20] sm:$0xff] %v3453_v28  ;;  %1318 = vmatmul.mubr.f32.vlgmr.msra.gmra.mrb[10].mxu0 %v3453_v28  ;;  %2280 = vmatmul.mubr.f32.vlgmr.msra.gmra.mrb[10].mxu1 %v3453_v28 }
 0x56a   :  { %2691 = vmatpush1.bf16.msra.mxu0 %v3324_v46  ;;  %2722 = vmatpush3.bf16.msra.mxu1 %v3327_v49 }
 0x56b   :  { %2693 = vmatprep.subr.bf16.mxu0 %v3331_v52  ;;  %2723 = vmatprep.subr.bf16.mxu1 %v2994_v0 }
 0x56c   :  { %1542 = vmatprep.mubr.f32.mxu0 %v2995_v1  ;;  %2314 = vmatprep.mubr.msk.f32.mxu1 %vm2996_vm0, %v2995_v1 }
 0x56e   :  { %2695 = vmatpush1.bf16.msra.mxu0 %v3334_v2  ;;  %2725 = vmatpush3.bf16.msra.mxu1 %v3337_v58 }
 0x56f   :  { %2697 = vmatprep.subr.bf16.mxu0 %v3341_v3  ;;  %2726 = vmatprep.subr.bf16.mxu1 %v2994_v0 }
 0x572   :  { %2699 = vmatpush1.bf16.msra.mxu0 %v3344_v12  ;;  %2728 = vmatpush3.bf16.msra.mxu1 %v3347_v18 }
 0x573   :  { %2701 = vmatprep.subr.bf16.mxu0 %v3351_v25  ;;  %2729 = vmatprep.subr.bf16.mxu1 %v2994_v0 }
 0x576   :  { %2703 = vmatpush1.bf16.msra.mxu0 %v3354_v17  ;;  %2731 = vmatpush3.bf16.msra.mxu1 %v3357_v23 }
 0x577   :  { %2705 = vmatprep.subr.bf16.mxu0 %v3361_v34  ;;  %2732 = vmatprep.subr.bf16.mxu1 %v2994_v0 }
 0x57a   :  { %2707 = vmatpush1.bf16.msra.mxu0 %v3364_v48  ;;  %2734 = vmatpush3.bf16.msra.mxu1 %v3367_v55 }
 0x57b   :  { %2709 = vmatprep.subr.bf16.mxu0 %v3370_v8  ;;  %2735 = vmatprep.subr.bf16.mxu1 %v2994_v0 }
 0x57e   :  { %2711 = vmatpush1.bf16.msra.mxu0 %v3373_v26  ;;  %2737 = vmatpush3.bf16.msra.mxu1 %v3375_v27 }
 0x57f   :  { %2713 = vmatprep.subr.bf16.mxu0 %v3379_v31  ;;  %2738 = vmatprep.subr.bf16.mxu1 %v2994_v0 }
 0x582   :  { %2715 = vmatpush1.bf16.msra.mxu0 %v3382_v47  ;;  %2740 = vmatpush3.bf16.msra.mxu1 %v3386_v50 }
 0x583   :  { %2717 = vmatprep.subr.bf16.mxu0 %v3388_v51  ;;  %2741 = vmatprep.subr.bf16.mxu1 %v2994_v0 }
 0x586   :  { %2719 = vmatpush1.bf16.msra.mxu0 %v3392_v61  ;;  %2743 = vmatpush3.bf16.msra.mxu1 %v3396_v62 }
 0x587   :  { %2745 = vmatprep.subr.bf16.mxu0 %v3322_v39  ;;  %2776 = vmatprep.subr.bf16.mxu1 %v2994_v0 }
 0x63c   :  { %v1319_v20 = vpop.f32.mrb[10].mxu0  ;;  %v1390_v6 = vpop.f32.mrb[10].mxu1 }
 0x63d   :  { %v1320_v37 = vadd.f32 %v1319_v20, %v3206_v35  ;;  %v1321_v40 = vpop.f32.mrb[11].mxu0  ;;  %v2281_v41 = vpop.f32.mrb[11].mxu1  ;;  %v1391_v14 = vadd.f32 %v1390_v6, %v3212_v60 }
 0x63e   :  { %v1322_v33 = vadd.f32 %v1321_v40, %v3208_v36  ;;  %v1653_v41 = vld [vmem:[#allocation3 + $0xb0] sm:$0xff] }
 0x63f   :  { %v1394_v45 = vadd.f32 %v1320_v37, %v1202_v29 }
 0x640   :  { %v1401_v56 = vadd.f32 %v1322_v33, %v1203_v54 }
 0x641   :  { %v1927_v43 = vmul.f32 -1.442695, %v1394_v45 }
 0x642   :  { %v1928_v57 = vmul.f32 -1.442695, %v1401_v56 }
 0x643   :  { %2864 = vpow2.f32 %v1927_v43 }
 0x644   :  { %2866 = vpow2.f32 %v1928_v57 }
 0x64d   :  { %v2865_v5 = vpop.eup %2864 }
 0x64e   :  { %v1398_v39 = vadd.f32 1.0, %v2865_v5  ;;  %v2867_v7 = vpop.eup %2866 }
 0x64f   :  { %v1405_v9 = vadd.f32 1.0, %v2867_v7 }
 0x650   :  { %2868 = vrcp.f32 %v1398_v39 }
 0x651   :  { %2870 = vrcp.f32 %v1405_v9 }
 0x65a   :  { %v2869_v19 = vpop.eup %2868 }
 0x65b   :  { %v1408_v10 = vmul.f32 %v2869_v19, %v1391_v14  ;;  %v2871_v16 = vpop.eup %2870 }
 0x65c   :  { %v1411_v22 = vsub.f32 1.0, %v2871_v16  ;;  %v1413_v38 = vmul.f32 %v2871_v16, %v3453_v28 }
 0x65d   :  { %v1409_v11 = vadd.f32 %v1408_v10, %v1204_v24  ;;  %v1870_v10 = vpop.permute.xlu1 %1869 }
 0x65f   :  { %2872 = vtanh.f32 %v1409_v11 }
 0x669   :  { %v2873_v30 = vpop.eup %2872 }
 0x66a   :  { %v1412_v32 = vmul.f32 %v2873_v30, %v1411_v22 }
 0x66c   :  { %v1414_v44 = vadd.f32 %v1413_v38, %v1412_v32 }
 0x66e   :  { %v3498_v53 = vsel %vm1421_vm14, %v1414_v44, %v3453_v28 }
 0x66f   :  { %1424 = vst [vmem:[#allocation8 + $0x28] sm:$0xff] %v3498_v53  ;;  %1543 = vmatmul.mubr.f32.vlgmr.msra.gmra.mrb[12].mxu0 %v3498_v53  ;;  %2315 = vmatmul.mubr.f32.vlgmr.msra.gmra.mrb[12].mxu1 %v3498_v53 }
 0x670   :  { %2747 = vmatpush1.bf16.msra.mxu0 %v3324_v46  ;;  %2778 = vmatpush3.bf16.msra.mxu1 %v3327_v49 }
 0x671   :  { %2749 = vmatprep.subr.bf16.mxu0 %v3331_v52  ;;  %2779 = vmatprep.subr.bf16.mxu1 %v2994_v0 }
 0x672   :  { %1767 = vmatprep.mubr.f32.mxu0 %v2995_v1  ;;  %2349 = vmatprep.mubr.msk.f32.mxu1 %vm2996_vm0, %v2995_v1  ;;  %v1427_v1 = vld [vmem:[#allocation3 + $0x90] sm:$0xff]  ;;  %vm1871_vm0 = vcmp.eq.s32.totalorder %v1870_v10, 1 }
 0x674   :  { %2751 = vmatpush1.bf16.msra.mxu0 %v3334_v2  ;;  %2781 = vmatpush3.bf16.msra.mxu1 %v3337_v58 }
 0x675   :  { %2753 = vmatprep.subr.bf16.mxu0 %v3341_v3  ;;  %2782 = vmatprep.subr.bf16.mxu1 %v2994_v0 }
 0x678   :  { %2755 = vmatpush1.bf16.msra.mxu0 %v3344_v12  ;;  %2784 = vmatpush3.bf16.msra.mxu1 %v3347_v18  ;;  %v1428_v18 = vld [vmem:[#allocation3 + $0x98] sm:$0xff] }
 0x679   :  { %2757 = vmatprep.subr.bf16.mxu0 %v3351_v25  ;;  %2785 = vmatprep.subr.bf16.mxu1 %v2994_v0 }
 0x67c   :  { %2759 = vmatpush1.bf16.msra.mxu0 %v3354_v17  ;;  %2787 = vmatpush3.bf16.msra.mxu1 %v3357_v23 }
 0x67d   :  { %2761 = vmatprep.subr.bf16.mxu0 %v3361_v34  ;;  %2788 = vmatprep.subr.bf16.mxu1 %v2994_v0 }
 0x680   :  { %2763 = vmatpush1.bf16.msra.mxu0 %v3364_v48  ;;  %2790 = vmatpush3.bf16.msra.mxu1 %v3367_v55 }
 0x681   :  { %2765 = vmatprep.subr.bf16.mxu0 %v3370_v8  ;;  %2791 = vmatprep.subr.bf16.mxu1 %v2994_v0 }
 0x684   :  { %2767 = vmatpush1.bf16.msra.mxu0 %v3373_v26  ;;  %2793 = vmatpush3.bf16.msra.mxu1 %v3375_v27  ;;  %v1429_v27 = vld [vmem:[#allocation3 + $0xa0] sm:$0xff] }
 0x685   :  { %2769 = vmatprep.subr.bf16.mxu0 %v3379_v31  ;;  %2794 = vmatprep.subr.bf16.mxu1 %v2994_v0 }
 0x688   :  { %2771 = vmatpush1.bf16.msra.mxu0 %v3382_v47  ;;  %2796 = vmatpush3.bf16.msra.mxu1 %v3386_v50 }
 0x689   :  { %2773 = vmatprep.subr.bf16.mxu0 %v3388_v51  ;;  %2797 = vmatprep.subr.bf16.mxu1 %v2994_v0 }
 0x68c   :  { %2775 = vmatpush1.bf16.msra.mxu0 %v3392_v61  ;;  %2799 = vmatpush3.bf16.msra.mxu1 %v3396_v62  ;;  %v1645_v62 = vpop.permute.xlu0 %1644 }
 0x68d   :  { %vm1646_vm15 = vcmp.eq.s32.totalorder %v1645_v62, 1 }
 0x742   :  { %v1544_v46 = vpop.f32.mrb[12].mxu0  ;;  %v1615_v49 = vpop.f32.mrb[12].mxu1 }
 0x743   :  { %v1545_v52 = vadd.f32 %v1544_v46, %v3206_v35  ;;  %v1546_v2 = vpop.f32.mrb[13].mxu0  ;;  %v2316_v58 = vpop.f32.mrb[13].mxu1  ;;  %v1616_v8 = vadd.f32 %v1615_v49, %v3212_v60 }
 0x744   :  { %v1547_v3 = vadd.f32 %v1546_v2, %v3208_v36 }
 0x745   :  { %v1619_v12 = vadd.f32 %v1545_v52, %v1427_v1 }
 0x746   :  { %v1626_v17 = vadd.f32 %v1547_v3, %v1428_v18 }
 0x747   :  { %v1930_v25 = vmul.f32 -1.442695, %v1619_v12 }
 0x748   :  { %v1931_v23 = vmul.f32 -1.442695, %v1626_v17 }
 0x749   :  { %2874 = vpow2.f32 %v1930_v25 }
 0x74a   :  { %2876 = vpow2.f32 %v1931_v23 }
 0x753   :  { %v2875_v0 = vpop.eup %2874 }
 0x754   :  { %v1623_v34 = vadd.f32 1.0, %v2875_v0  ;;  %v2877_v48 = vpop.eup %2876 }
 0x755   :  { %v1630_v55 = vadd.f32 1.0, %v2877_v48 }
 0x756   :  { %2878 = vrcp.f32 %v1623_v34 }
 0x757   :  { %2880 = vrcp.f32 %v1630_v55 }
 0x760   :  { %v2879_v26 = vpop.eup %2878 }
 0x761   :  { %v1633_v31 = vmul.f32 %v2879_v26, %v1616_v8  ;;  %v2881_v50 = vpop.eup %2880 }
 0x762   :  { %v1636_v51 = vsub.f32 1.0, %v2881_v50  ;;  %v1638_v63 = vmul.f32 %v2881_v50, %v3498_v53 }
 0x763   :  { %v1634_v47 = vadd.f32 %v1633_v31, %v1429_v27 }
 0x765   :  { %2882 = vtanh.f32 %v1634_v47 }
 0x76f   :  { %v2883_v61 = vpop.eup %2882 }
 0x770   :  { %v1637_v59 = vmul.f32 %v2883_v61, %v1636_v51 }
 0x772   :  { %v1639_v4 = vadd.f32 %v1638_v63, %v1637_v59 }
 0x774   :  { %v1647_v13 = vsel %vm1646_vm15, %v1639_v4, %v3498_v53 }
 0x775   :  { %1649 = vst [vmem:[#allocation8 + $0x30] sm:$0xff] %v1647_v13  ;;  %1768 = vmatmul.mubr.f32.vlgmr.msra.gmra.mrb[14].mxu0 %v1647_v13  ;;  %2350 = vmatmul.mubr.f32.vlgmr.msra.gmra.mrb[14].mxu1 %v1647_v13 }
 0x848   :  { %v1769_v21 = vpop.f32.mrb[14].mxu0  ;;  %v1840_v28 = vpop.f32.mrb[14].mxu1 }
 0x849   :  { %v1770_v29 = vadd.f32 %v1769_v21, %v3206_v35  ;;  %v1771_v20 = vpop.f32.mrb[15].mxu0  ;;  %v2351_v6 = vpop.f32.mrb[15].mxu1  ;;  %v1841_v39 = vadd.f32 %v1840_v28, %v3212_v60  ;;  %v1654_v35 = vld [vmem:[#allocation3 + $0xb8] sm:$0xff] }
 0x84a   :  { %v1772_v37 = vadd.f32 %v1771_v20, %v3208_v36 }
 0x84b   :  { %v1844_v40 = vadd.f32 %v1770_v29, %v1652_v15 }
 0x84c   :  { %v1851_v45 = vadd.f32 %v1772_v37, %v1653_v41 }
 0x84d   :  { %v1933_v33 = vmul.f32 -1.442695, %v1844_v40 }
 0x84e   :  { %v1934_v54 = vmul.f32 -1.442695, %v1851_v45 }
 0x84f   :  { %2884 = vpow2.f32 %v1933_v33 }
 0x850   :  { %2886 = vpow2.f32 %v1934_v54 }
 0x859   :  { %v2885_v43 = vpop.eup %2884 }
 0x85a   :  { %v1848_v56 = vadd.f32 1.0, %v2885_v43  ;;  %v2887_v57 = vpop.eup %2886 }
 0x85b   :  { %v1855_v5 = vadd.f32 1.0, %v2887_v57 }
 0x85c   :  { %2888 = vrcp.f32 %v1848_v56 }
 0x85d   :  { %2890 = vrcp.f32 %v1855_v5 }
 0x866   :  { %v2889_v7 = vpop.eup %2888 }
 0x867   :  { %v1858_v9 = vmul.f32 %v2889_v7, %v1841_v39  ;;  %v2891_v36 = vpop.eup %2890 }
 0x868   :  { %v1861_v19 = vsub.f32 1.0, %v2891_v36  ;;  %v1863_v16 = vmul.f32 %v2891_v36, %v1647_v13 }
 0x869   :  { %v1859_v14 = vadd.f32 %v1858_v9, %v1654_v35 }
 0x86b   :  { %2892 = vtanh.f32 %v1859_v14 }
 0x875   :  { %v2893_v24 = vpop.eup %2892 }
 0x876   :  { %v1862_v11 = vmul.f32 %v2893_v24, %v1861_v19 }
 0x878   :  { %v1864_v22 = vadd.f32 %v1863_v16, %v1862_v11 }
 0x87a   :  { %v1872_v60 = vsel %vm1871_vm0, %v1864_v22, %v1647_v13 }
 0x87b   :  { %1874 = vst [vmem:[#allocation8 + $0x38] sm:$0xff] %v1872_v60  ;;  %1879 = vst [vmem:[#allocation9] sm:$0xff] %v1872_v60 }
 0x87c   :  { %2949 = shalt.err (!%p2946_p6)
}
 0x87d   :  { %s2950_s7 = scalar_lea.hbm %s3580_s5, 1024 }
 0x87e   :  { %p2951_p7 = scmp.ne.s32.totalorder %s3580_s5, %s2950_s7  ;;  %p2954_p8 = scmp.lt.u32.totalorder %s2950_s7, %s3580_s5 }
 0x880   :  { %p2956_p9 = pnand %p2954_p8, %p2951_p7 }
 0x882   :  { %2959 = shalt.err (!%p2956_p9)
}
 0x883   :  { %s3000_s12 = smov 128   ;;  %s3001_s13 = smov 8  }
 0x884   :  { %1891 = dma.vmem_to_hbm [thread:$0]  %s1886_s25, 1024, %s3580_s5, [#allocation5], %s3000_s12, %s3000_s12, %s3001_s13  }
 0x885   :  { %s2960_s16 = scalar_lea.vmem %s3544_s27, 128  ;;  %p2965_p11 = scmp.lt.s32.totalorder %s3544_s27, %s3544_s27 }
 0x886   :  { %p2961_p10 = scmp.ne.s32.totalorder %s3544_s27, %s2960_s16  ;;  %p2966_p12 = scmp.lt.s32.totalorder %s2960_s16, %s2960_s16 }
 0x888   :  { %p2967_p13 = por %p2966_p12, %p2965_p11 }
 0x88a   :  { %p2968_p0 = pnand %p2967_p13, %p2961_p10 }
 0x88c   :  { %2971 = shalt.err (!%p2968_p0)
}
 0x88d   :  { %s2972_s19 = scalar_lea.hbm %s3581_s6, 128 }
 0x88e   :  { %p2973_p1 = scmp.ne.s32.totalorder %s3581_s6, %s2972_s19  ;;  %p2976_p2 = scmp.lt.u32.totalorder %s2972_s19, %s3581_s6 }
 0x890   :  { %p2978_p3 = pnand %p2976_p2, %p2973_p1 }
 0x892   :  { %2981 = shalt.err (!%p2978_p3)
}
 0x893   :  { %1901 = dma.vmem_to_hbm [thread:$0]  %s3544_s27, 128, %s3581_s6, [#allocation10]  }
 0x894   :  { %2986 = dma.done.wait [#allocation5], 1024  }
 0x895   :  { %2987 = vsyncadd [#allocation5], 4294966272 }
 0x896   :  { %2988 = dma.done.wait [#allocation10], 128  }
 0x897   :  { %2989 = vsyncadd [#allocation10], 4294967168 }
 0x898   :  { %1908 = vsyncpa [#allocation4], 1 }
 0x899   :  { %1909 = vsyncpa [#allocation7], 1 }
 0x89a   :  { %1910 = vsyncpa [#allocation5], 1 }
 0x89b   :  { %1911 = vsyncpa [#allocation10], 1 }

</bundles_post_ra>
